<compile_context>
chip_gen: v6e
topology: v6e:2x2x1
jax: 0.10.0
libtpu: 0.0.40
codegen_flags: <defaults>
</compile_context>

<pallas_src>
import functools

import jax
import jax.numpy as jnp
from jax.experimental import pallas as pl
from jax.experimental.pallas import tpu as pltpu


def _rnn_fused_kernel(x_ref, w1_ref, b1_ref, wih_ref, bin_ref,
                      whh_ref, bhhn_ref, w2_ref, b2_ref,
                      q_ref,
                      h_ref, hseq_ref, gx_ref,
                      *, tc, bp, hp, mm_dtype):
    c = pl.program_id(0)

    # h_0 = zeros (PyTorch GRU default when hidden=None / after reset_hidden()).
    @pl.when(c == 0)
    def _():
        h_ref[...] = jnp.zeros_like(h_ref)

    # ---- hoisted, chunk-batched input path: linear1 + ReLU, fused input gates ----
    xl = jnp.dot(x_ref[...], w1_ref[...],
                 preferred_element_type=jnp.float32) + b1_ref[...]     # (rows, Hp)
    xl = jnp.maximum(xl, 0.0).astype(mm_dtype)
    # gx = xl @ [Wir^T | Wiz^T | Win^T]  + (bih + bhh folded for r,z; bih only for n)
    gx_ref[...] = (jnp.dot(xl, wih_ref[...],
                           preferred_element_type=jnp.float32)
                   + bin_ref[...])                                     # (rows, 3*Hp) f32

    # b_hh_n broadcast hoisted out of the unrolled loop (broadcast_in_dim is not CSE'd).
    bhh_n = jnp.broadcast_to(bhhn_ref[...], (bp, hp))                  # (bp, Hp) f32

    # ---- sequential GRU recurrence: ONE fused h_prev @ Whh_all GEMM per step ----
    def step(i, h_prev):
        row = pl.multiple_of(i * bp, bp)                               # 8-aligned sublanes
        gh = jnp.dot(h_prev.astype(mm_dtype), whh_ref[...],
                     preferred_element_type=jnp.float32)               # (bp, 3*Hp)
        gx_t = gx_ref[pl.ds(row, bp), :]                               # (bp, 3*Hp)
        r = jax.nn.sigmoid(gx_t[:, 0:hp] + gh[:, 0:hp])
        z = jax.nn.sigmoid(gx_t[:, hp:2 * hp] + gh[:, hp:2 * hp])
        n = jnp.tanh(gx_t[:, 2 * hp:3 * hp] + r * (gh[:, 2 * hp:3 * hp] + bhh_n))
        h_new = n + z * (h_prev - n)                                   # == (1-z)*n + z*h
        hseq_ref[pl.ds(row, bp), :] = h_new
        return h_new                                                   # carried in vregs

    h_last = jax.lax.fori_loop(0, tc, step, h_ref[...], unroll=True)
    h_ref[...] = h_last                                                # cross-chunk carry

    # ---- hoisted output projection for the whole chunk (lane-dense store) ----
    q_ref[...] = (jnp.dot(hseq_ref[...].astype(mm_dtype), w2_ref[...],
                          preferred_element_type=jnp.float32)
                  + b2_ref[...]).astype(q_ref.dtype)


def _round_up(x, m):
    return (x + m - 1) // m * m


def rnn_forward(obs, params, *, time_chunk=None, matmul_dtype=jnp.bfloat16):
    """Forward pass of RNN (Linear->ReLU->GRU->Linear). obs: (B, S, I), batch_first."""
    w1, b1, wih, bih, whh, bhh, w2, b2 = params
    B, S, I = obs.shape
    H = w1.shape[0]
    O = w2.shape[0]

    LANE, SUB = 128, 8
    Hp, Op = _round_up(H, LANE), _round_up(O, LANE)
    Bp = _round_up(B, SUB)

    # Time chunk: clamp to S, prefer a divisor of S (avoids padded tail steps).
    tc_req = max(1, min(time_chunk if time_chunk is not None else 32, S))
    tc = tc_req
    for cand in range(tc_req, max(tc_req // 2, 1) - 1, -1):
        if S % cand == 0:
            tc = cand
            break
    Sp = _round_up(S, tc)
    n_chunks = Sp // tc
    rows = tc * Bp                                                     # rows per chunk
    R = Sp * Bp

    f32 = jnp.float32
    mmd = matmul_dtype
    mm_sz = jnp.dtype(mmd).itemsize

    # ---- weights: pre-transposed, gate blocks fused along lanes, padded, bf16 ----
    w1t_p = jnp.pad(w1.astype(f32).T, ((0, 0), (0, Hp - H))).astype(mmd)   # (I, Hp)
    b1_p = jnp.pad(b1.astype(f32), (0, Hp - H))[None, :]                   # (1, Hp) f32

    def fuse_gates_T(w):  # (3H, H) -> (Hp, 3*Hp): per-gate W^T, concat along lanes
        wt = jnp.transpose(w.astype(f32).reshape(3, H, H), (0, 2, 1))      # (3, in, out)
        wt = jnp.pad(wt, ((0, 0), (0, Hp - H), (0, Hp - H)))               # (3, Hp, Hp)
        return jnp.transpose(wt, (1, 0, 2)).reshape(Hp, 3 * Hp)

    wih_f = fuse_gates_T(wih).astype(mmd)                                  # (Hp, 3*Hp)
    whh_f = fuse_gates_T(whh).astype(mmd)                                  # (Hp, 3*Hp)

    bih3 = bih.astype(f32).reshape(3, H)
    bhh3 = bhh.astype(f32).reshape(3, H)
    # Fold b_ih (r,z,n) and b_hh (r,z only) into the chunk-batched gx bias.
    b_in_fold = jnp.stack([bih3[0] + bhh3[0], bih3[1] + bhh3[1], bih3[2]], axis=0)
    b_in_fold = jnp.pad(b_in_fold, ((0, 0), (0, Hp - H))).reshape(1, 3 * Hp)  # (1, 3*Hp)
    bhh_n_p = jnp.pad(bhh3[2], (0, Hp - H))[None, :]                          # (1, Hp)

    w2t_p = jnp.pad(w2.astype(f32).T, ((0, Hp - H), (0, Op - O))).astype(mmd)  # (Hp, Op)
    b2_p = jnp.pad(b2.astype(f32), (0, Op - O))[None, :]                       # (1, Op)

    # ---- input: time-major rows, batch padded to 8 sublanes, feature dim UNpadded ----
    x = jnp.transpose(obs.astype(f32), (1, 0, 2))                      # (S, B, I)
    x = jnp.pad(x, ((0, Sp - S), (0, Bp - B), (0, 0)))                 # (Sp, Bp, I)
    x = x.reshape(R, I).astype(mmd)

    def full_spec(shape):
        zeros = (0,) * len(shape)
        return pl.BlockSpec(shape, lambda c, _z=zeros: _z)

    kernel = functools.partial(_rnn_fused_kernel, tc=tc, bp=Bp, hp=Hp, mm_dtype=mmd)

    # Explicit VMEM budget (clamped to v7x's 64 MiB physical per TensorCore).
    vmem_est = (
        2 * rows * I * mm_sz                                   # x blocks (double-buffered)
        + 2 * rows * Op * 4                                    # q blocks (double-buffered)
        + 2 * (I * Hp + 2 * 3 * Hp * Hp + Hp * Op) * mm_sz     # weights
        + 2 * (Hp + 3 * Hp + Hp + Op) * 4                      # biases
        + Bp * Hp * 4 + rows * Hp * 4 + rows * 3 * Hp * 4      # h / hseq / gx scratch
    )
    vmem_limit = int(min(max(2 * vmem_est, 32 << 20), 64 << 20))

    q_flat = pl.pallas_call(
        kernel,
        out_shape=jax.ShapeDtypeStruct((R, Op), f32),
        grid_spec=pltpu.PrefetchScalarGridSpec(
            num_scalar_prefetch=0,
            grid=(n_chunks,),
            in_specs=[
                pl.BlockSpec((rows, I), lambda c: (c, 0)),             # x chunk
                full_spec((I, Hp)),                                    # W1^T
                full_spec((1, Hp)),                                    # b1
                full_spec((Hp, 3 * Hp)),                               # W_ih^T fused gates
                full_spec((1, 3 * Hp)),                                # folded input biases
                full_spec((Hp, 3 * Hp)),                               # W_hh^T fused gates
                full_spec((1, Hp)),                                    # b_hh_n
                full_spec((Hp, Op)),                                   # W2^T
                full_spec((1, Op)),                                    # b2
            ],
            out_specs=pl.BlockSpec((rows, Op), lambda c: (c, 0)),
            scratch_shapes=[
                pltpu.VMEM((Bp, Hp), f32),                             # h (carried across chunks)
                pltpu.VMEM((rows, Hp), f32),                           # h_seq for current chunk
                pltpu.VMEM((rows, 3 * Hp), f32),                       # precomputed input gates
            ],
        ),
        compiler_params=pltpu.CompilerParams(
            dimension_semantics=("arbitrary",),                        # recurrence -> sequential
            vmem_limit_bytes=vmem_limit,
        ),
    )(x, w1t_p, b1_p, wih_f, b_in_fold, whh_f, bhh_n_p, w2t_p, b2_p)

    # Un-pad: (R, Op) -> (S, B, O) -> batch_first (B, S, O).
    q = q_flat.reshape(Sp, Bp, Op)[:S, :B, :O]
    return jnp.transpose(q, (1, 0, 2))


def init_params(key, input_size, hidden_size, output_size):
    """Deterministic synthetic params in native nn.Linear / nn.GRU shapes."""
    I, H, O = input_size, hidden_size, output_size
    ks = jax.random.split(key, 8)
    u = lambda k, shape, s: jax.random.uniform(k, shape, jnp.float32, minval=-s, maxval=s)
    w1 = u(ks[0], (H, I), 1.0 / jnp.sqrt(I))        # linear1.weight
    b1 = u(ks[1], (H,), 1.0 / jnp.sqrt(I))          # linear1.bias
    wih = u(ks[2], (3 * H, H), 1.0 / jnp.sqrt(H))   # gru.weight_ih_l0 (r,z,n stacked)
    bih = u(ks[3], (3 * H,), 1.0 / jnp.sqrt(H))     # gru.bias_ih_l0
    whh = u(ks[4], (3 * H, H), 1.0 / jnp.sqrt(H))   # gru.weight_hh_l0
    bhh = u(ks[5], (3 * H,), 1.0 / jnp.sqrt(H))     # gru.bias_hh_l0
    w2 = u(ks[6], (O, H), 1.0 / jnp.sqrt(H))        # linear2.weight
    b2 = u(ks[7], (O,), 1.0 / jnp.sqrt(H))          # linear2.bias
    return (w1, b1, wih, bih, whh, bhh, w2, b2)


def rnn_reference(obs, params):
    """Pure-JAX reference mirroring the PyTorch module semantics."""
    w1, b1, wih, bih, whh, bhh, w2, b2 = params
    x = jnp.maximum(obs.astype(jnp.float32) @ w1.T + b1, 0.0)          # (B, S, H)
    B, S, H = x.shape

    def step(h, x_t):
        gx = x_t @ wih.T + bih
        gh = h @ whh.T + bhh
        r = jax.nn.sigmoid(gx[:, :H] + gh[:, :H])
        z = jax.nn.sigmoid(gx[:, H:2 * H] + gh[:, H:2 * H])
        n = jnp.tanh(gx[:, 2 * H:] + r * gh[:, 2 * H:])
        h_new = (1.0 - z) * n + z * h
        return h_new, h_new

    h0 = jnp.zeros((B, H), jnp.float32)
    _, hs = jax.lax.scan(step, h0, jnp.transpose(x, (1, 0, 2)))        # (S, B, H)
    return jnp.transpose(hs, (1, 0, 2)) @ w2.T + b2                    # (B, S, O)


if __name__ == "__main__":
    B, S = 2, 8
    INPUT, HIDDEN, OUTPUT = 16, 32, 4

    key = jax.random.PRNGKey(0)
    k_obs, k_par = jax.random.split(key)
    obs = jax.random.normal(k_obs, (B, S, INPUT), jnp.float32)
    params = init_params(k_par, INPUT, HIDDEN, OUTPUT)

    q_ref = rnn_reference(obs, params)

    # f32-operand validation path: tight tolerance against the pure-JAX reference.
    fwd_f32 = jax.jit(functools.partial(rnn_forward, matmul_dtype=jnp.float32))
    q32 = jax.block_until_ready(fwd_f32(obs, params))
    assert q32.shape == (B, S, OUTPUT)
    assert jnp.allclose(q32, q_ref, atol=1e-4, rtol=1e-4), "f32 path mismatch vs reference"

    # bf16-operand fast path (native MXU dtype on v5e/v6e/v7x): looser tolerance by design.
    fwd_bf16 = jax.jit(functools.partial(rnn_forward, matmul_dtype=jnp.bfloat16))
    qbf = jax.block_until_ready(fwd_bf16(obs, params))
    assert qbf.shape == (B, S, OUTPUT)
    assert jnp.allclose(qbf, q_ref, atol=5e-2, rtol=5e-2), "bf16 path mismatch vs reference"

    print("KERNEL_OK")
</pallas_src>

<mosaic_0001>
module attributes {stable_mosaic.version = 11 : i64} {
  func.func @_rnn_fused_kernel(%arg0: i32, %arg1: memref<64x16xf32, #tpu.memory_space<vmem>>, %arg2: memref<16x128xf32, #tpu.memory_space<vmem>>, %arg3: memref<1x128xf32, #tpu.memory_space<vmem>>, %arg4: memref<128x384xf32, #tpu.memory_space<vmem>>, %arg5: memref<1x384xf32, #tpu.memory_space<vmem>>, %arg6: memref<128x384xf32, #tpu.memory_space<vmem>>, %arg7: memref<1x128xf32, #tpu.memory_space<vmem>>, %arg8: memref<128x128xf32, #tpu.memory_space<vmem>>, %arg9: memref<1x128xf32, #tpu.memory_space<vmem>>, %arg10: memref<64x128xf32, #tpu.memory_space<vmem>>, %arg11: memref<8x128xf32, #tpu.memory_space<vmem>>, %arg12: memref<64x128xf32, #tpu.memory_space<vmem>>, %arg13: memref<64x384xf32, #tpu.memory_space<vmem>>) attributes {dimension_semantics = [#tpu.dimension_semantics<arbitrary>], iteration_bounds = array<i64: 1>, scalar_prefetch = 0 : i64, scratch_operands = 3 : i64, tpu.core_type = #tpu.core_type<tc>, window_params = [{transform_indices = @transform_0, window_bounds = array<i64: 64, 16>}, {pipeline_mode = #tpu.pipeline_mode<synchronous>, transform_indices = @transform_1, window_bounds = array<i64: 16, 128>}, {pipeline_mode = #tpu.pipeline_mode<synchronous>, transform_indices = @transform_2, window_bounds = array<i64: 1, 128>}, {pipeline_mode = #tpu.pipeline_mode<synchronous>, transform_indices = @transform_3, window_bounds = array<i64: 128, 384>}, {pipeline_mode = #tpu.pipeline_mode<synchronous>, transform_indices = @transform_4, window_bounds = array<i64: 1, 384>}, {pipeline_mode = #tpu.pipeline_mode<synchronous>, transform_indices = @transform_5, window_bounds = array<i64: 128, 384>}, {pipeline_mode = #tpu.pipeline_mode<synchronous>, transform_indices = @transform_6, window_bounds = array<i64: 1, 128>}, {pipeline_mode = #tpu.pipeline_mode<synchronous>, transform_indices = @transform_7, window_bounds = array<i64: 128, 128>}, {pipeline_mode = #tpu.pipeline_mode<synchronous>, transform_indices = @transform_8, window_bounds = array<i64: 1, 128>}, {transform_indices = @transform_9, window_bounds = array<i64: 64, 128>}]} {
    %c0_i32 = arith.constant 0 : i32
    %0 = arith.cmpi eq, %arg0, %c0_i32 : i32
    %1 = arith.extui %0 : i1 to i32
    %c0_i32_0 = arith.constant 0 : i32
    %2 = arith.cmpi ne, %1, %c0_i32_0 : i32
    scf.if %2 {
      %cst_94 = arith.constant 0.000000e+00 : f32
      %293 = vector.broadcast %cst_94 : f32 to vector<8x128xf32>
      %c0_95 = arith.constant 0 : index
      %c0_96 = arith.constant 0 : index
      %294 = vector.load %arg11[%c0_95, %c0_96] : memref<8x128xf32, #tpu.memory_space<vmem>>, vector<8x128xf32>
      tpu.vector_store %arg11[%c0_95, %c0_96], %293 {strides = array<i32>} : memref<8x128xf32, #tpu.memory_space<vmem>>, vector<8x128xf32>,
    } else {
    }
    %c0 = arith.constant 0 : index
    %c0_1 = arith.constant 0 : index
    %3 = vector.load %arg1[%c0, %c0_1] : memref<64x16xf32, #tpu.memory_space<vmem>>, vector<64x16xf32>
    %c0_2 = arith.constant 0 : index
    %c0_3 = arith.constant 0 : index
    %4 = vector.load %arg2[%c0_2, %c0_3] : memref<16x128xf32, #tpu.memory_space<vmem>>, vector<16x128xf32>
    %cst = arith.constant dense<0.000000e+00> : vector<64x128xf32>
    %5 = tpu.matmul %3, %4, %cst {dimension_numbers = #tpu.dot_dimension_numbers<[1], [0], [0], [1], [0, 0, 1, 1], [], []>} : vector<64x16xf32>, vector<16x128xf32>, vector<64x128xf32> -> vector<64x128xf32>
    %c0_4 = arith.constant 0 : index
    %c0_5 = arith.constant 0 : index
    %6 = vector.load %arg3[%c0_4, %c0_5] : memref<1x128xf32, #tpu.memory_space<vmem>>, vector<1x128xf32>
    %7 = vector.broadcast %6 : vector<1x128xf32> to vector<64x128xf32>
    %8 = arith.addf %5, %7 : vector<64x128xf32>
    %cst_6 = arith.constant 0.000000e+00 : f32
    %9 = vector.broadcast %cst_6 : f32 to vector<64x128xf32>
    %10 = arith.maximumf %8, %9 : vector<64x128xf32>
    %c0_7 = arith.constant 0 : index
    %c0_8 = arith.constant 0 : index
    %11 = vector.load %arg4[%c0_7, %c0_8] : memref<128x384xf32, #tpu.memory_space<vmem>>, vector<128x384xf32>
    %cst_9 = arith.constant dense<0.000000e+00> : vector<64x384xf32>
    %12 = tpu.matmul %10, %11, %cst_9 {dimension_numbers = #tpu.dot_dimension_numbers<[1], [0], [0], [1], [0, 0, 1, 1], [], []>} : vector<64x128xf32>, vector<128x384xf32>, vector<64x384xf32> -> vector<64x384xf32>
    %c0_10 = arith.constant 0 : index
    %c0_11 = arith.constant 0 : index
    %13 = vector.load %arg5[%c0_10, %c0_11] : memref<1x384xf32, #tpu.memory_space<vmem>>, vector<1x384xf32>
    %14 = vector.broadcast %13 : vector<1x384xf32> to vector<64x384xf32>
    %15 = arith.addf %12, %14 : vector<64x384xf32>
    %c0_12 = arith.constant 0 : index
    %c0_13 = arith.constant 0 : index
    %16 = vector.load %arg13[%c0_12, %c0_13] : memref<64x384xf32, #tpu.memory_space<vmem>>, vector<64x384xf32>
    tpu.vector_store %arg13[%c0_12, %c0_13], %15 {strides = array<i32>} : memref<64x384xf32, #tpu.memory_space<vmem>>, vector<64x384xf32>,
    %c0_14 = arith.constant 0 : index
    %c0_15 = arith.constant 0 : index
    %17 = vector.load %arg7[%c0_14, %c0_15] : memref<1x128xf32, #tpu.memory_space<vmem>>, vector<1x128xf32>
    %18 = vector.shape_cast %17 : vector<1x128xf32> to vector<1x128xf32>
    %19 = vector.broadcast %18 : vector<1x128xf32> to vector<8x128xf32>
    %c0_16 = arith.constant 0 : index
    %c0_17 = arith.constant 0 : index
    %20 = vector.load %arg11[%c0_16, %c0_17] : memref<8x128xf32, #tpu.memory_space<vmem>>, vector<8x128xf32>
    %c0_i32_18 = arith.constant 0 : i32
    %c8_i32 = arith.constant 8 : i32
    %21 = arith.muli %c0_i32_18, %c8_i32 : i32
    %22 = tpu.assume_multiple %21, 8 : i32
    %c0_19 = arith.constant 0 : index
    %c0_20 = arith.constant 0 : index
    %23 = vector.load %arg6[%c0_19, %c0_20] : memref<128x384xf32, #tpu.memory_space<vmem>>, vector<128x384xf32>
    %cst_21 = arith.constant dense<0.000000e+00> : vector<8x384xf32>
    %24 = tpu.matmul %20, %23, %cst_21 {dimension_numbers = #tpu.dot_dimension_numbers<[1], [0], [0], [1], [0, 0, 1, 1], [], []>} : vector<8x128xf32>, vector<128x384xf32>, vector<8x384xf32> -> vector<8x384xf32>
    %25 = arith.index_cast %22 : i32 to index
    %c0_22 = arith.constant 0 : index
    %26 = vector.load %arg13[%25, %c0_22] : memref<64x384xf32, #tpu.memory_space<vmem>>, vector<8x384xf32>
    %27 = vector.extract_strided_slice %26 {offsets = [0, 0], sizes = [8, 128], strides = [1, 1]} : vector<8x384xf32> to vector<8x128xf32>
    %28 = vector.extract_strided_slice %24 {offsets = [0, 0], sizes = [8, 128], strides = [1, 1]} : vector<8x384xf32> to vector<8x128xf32>
    %29 = arith.addf %27, %28 : vector<8x128xf32>
    %30 = arith.negf %29 : vector<8x128xf32>
    %31 = math.exp %30 : vector<8x128xf32>
    %cst_23 = arith.constant 1.000000e+00 : f32
    %32 = vector.broadcast %cst_23 : f32 to vector<8x128xf32>
    %33 = arith.addf %32, %31 : vector<8x128xf32>
    %34 = arith.divf %32, %33 : vector<8x128xf32>
    %35 = vector.extract_strided_slice %26 {offsets = [0, 128], sizes = [8, 128], strides = [1, 1]} : vector<8x384xf32> to vector<8x128xf32>
    %36 = vector.extract_strided_slice %24 {offsets = [0, 128], sizes = [8, 128], strides = [1, 1]} : vector<8x384xf32> to vector<8x128xf32>
    %37 = arith.addf %35, %36 : vector<8x128xf32>
    %38 = arith.negf %37 : vector<8x128xf32>
    %39 = math.exp %38 : vector<8x128xf32>
    %cst_24 = arith.constant 1.000000e+00 : f32
    %40 = vector.broadcast %cst_24 : f32 to vector<8x128xf32>
    %41 = arith.addf %40, %39 : vector<8x128xf32>
    %42 = arith.divf %40, %41 : vector<8x128xf32>
    %43 = vector.extract_strided_slice %26 {offsets = [0, 256], sizes = [8, 128], strides = [1, 1]} : vector<8x384xf32> to vector<8x128xf32>
    %44 = vector.extract_strided_slice %24 {offsets = [0, 256], sizes = [8, 128], strides = [1, 1]} : vector<8x384xf32> to vector<8x128xf32>
    %45 = arith.addf %44, %19 : vector<8x128xf32>
    %46 = arith.mulf %34, %45 : vector<8x128xf32>
    %47 = arith.addf %43, %46 : vector<8x128xf32>
    %48 = math.tanh %47 : vector<8x128xf32>
    %49 = arith.subf %20, %48 : vector<8x128xf32>
    %50 = arith.mulf %42, %49 : vector<8x128xf32>
    %51 = arith.addf %48, %50 : vector<8x128xf32>
    %52 = arith.index_cast %22 : i32 to index
    %c0_25 = arith.constant 0 : index
    %53 = vector.load %arg12[%52, %c0_25] : memref<64x128xf32, #tpu.memory_space<vmem>>, vector<8x128xf32>
    tpu.vector_store %arg12[%52, %c0_25], %51 {strides = array<i32>} : memref<64x128xf32, #tpu.memory_space<vmem>>, vector<8x128xf32>,
    %c1_i32 = arith.constant 1 : i32
    %c8_i32_26 = arith.constant 8 : i32
    %54 = arith.muli %c1_i32, %c8_i32_26 : i32
    %55 = tpu.assume_multiple %54, 8 : i32
    %c0_27 = arith.constant 0 : index
    %c0_28 = arith.constant 0 : index
    %56 = vector.load %arg6[%c0_27, %c0_28] : memref<128x384xf32, #tpu.memory_space<vmem>>, vector<128x384xf32>
    %cst_29 = arith.constant dense<0.000000e+00> : vector<8x384xf32>
    %57 = tpu.matmul %51, %56, %cst_29 {dimension_numbers = #tpu.dot_dimension_numbers<[1], [0], [0], [1], [0, 0, 1, 1], [], []>} : vector<8x128xf32>, vector<128x384xf32>, vector<8x384xf32> -> vector<8x384xf32>
    %58 = arith.index_cast %55 : i32 to index
    %c0_30 = arith.constant 0 : index
    %59 = vector.load %arg13[%58, %c0_30] : memref<64x384xf32, #tpu.memory_space<vmem>>, vector<8x384xf32>
    %60 = vector.extract_strided_slice %59 {offsets = [0, 0], sizes = [8, 128], strides = [1, 1]} : vector<8x384xf32> to vector<8x128xf32>
    %61 = vector.extract_strided_slice %57 {offsets = [0, 0], sizes = [8, 128], strides = [1, 1]} : vector<8x384xf32> to vector<8x128xf32>
    %62 = arith.addf %60, %61 : vector<8x128xf32>
    %63 = arith.negf %62 : vector<8x128xf32>
    %64 = math.exp %63 : vector<8x128xf32>
    %cst_31 = arith.constant 1.000000e+00 : f32
    %65 = vector.broadcast %cst_31 : f32 to vector<8x128xf32>
    %66 = arith.addf %65, %64 : vector<8x128xf32>
    %67 = arith.divf %65, %66 : vector<8x128xf32>
    %68 = vector.extract_strided_slice %59 {offsets = [0, 128], sizes = [8, 128], strides = [1, 1]} : vector<8x384xf32> to vector<8x128xf32>
    %69 = vector.extract_strided_slice %57 {offsets = [0, 128], sizes = [8, 128], strides = [1, 1]} : vector<8x384xf32> to vector<8x128xf32>
    %70 = arith.addf %68, %69 : vector<8x128xf32>
    %71 = arith.negf %70 : vector<8x128xf32>
    %72 = math.exp %71 : vector<8x128xf32>
    %cst_32 = arith.constant 1.000000e+00 : f32
    %73 = vector.broadcast %cst_32 : f32 to vector<8x128xf32>
    %74 = arith.addf %73, %72 : vector<8x128xf32>
    %75 = arith.divf %73, %74 : vector<8x128xf32>
    %76 = vector.extract_strided_slice %59 {offsets = [0, 256], sizes = [8, 128], strides = [1, 1]} : vector<8x384xf32> to vector<8x128xf32>
    %77 = vector.extract_strided_slice %57 {offsets = [0, 256], sizes = [8, 128], strides = [1, 1]} : vector<8x384xf32> to vector<8x128xf32>
    %78 = arith.addf %77, %19 : vector<8x128xf32>
    %79 = arith.mulf %67, %78 : vector<8x128xf32>
    %80 = arith.addf %76, %79 : vector<8x128xf32>
    %81 = math.tanh %80 : vector<8x128xf32>
    %82 = arith.subf %51, %81 : vector<8x128xf32>
    %83 = arith.mulf %75, %82 : vector<8x128xf32>
    %84 = arith.addf %81, %83 : vector<8x128xf32>
    %85 = arith.index_cast %55 : i32 to index
    %c0_33 = arith.constant 0 : index
    %86 = vector.load %arg12[%85, %c0_33] : memref<64x128xf32, #tpu.memory_space<vmem>>, vector<8x128xf32>
    tpu.vector_store %arg12[%85, %c0_33], %84 {strides = array<i32>} : memref<64x128xf32, #tpu.memory_space<vmem>>, vector<8x128xf32>,
    %c2_i32 = arith.constant 2 : i32
    %c8_i32_34 = arith.constant 8 : i32
    %87 = arith.muli %c2_i32, %c8_i32_34 : i32
    %88 = tpu.assume_multiple %87, 8 : i32
    %c0_35 = arith.constant 0 : index
    %c0_36 = arith.constant 0 : index
    %89 = vector.load %arg6[%c0_35, %c0_36] : memref<128x384xf32, #tpu.memory_space<vmem>>, vector<128x384xf32>
    %cst_37 = arith.constant dense<0.000000e+00> : vector<8x384xf32>
    %90 = tpu.matmul %84, %89, %cst_37 {dimension_numbers = #tpu.dot_dimension_numbers<[1], [0], [0], [1], [0, 0, 1, 1], [], []>} : vector<8x128xf32>, vector<128x384xf32>, vector<8x384xf32> -> vector<8x384xf32>
    %91 = arith.index_cast %88 : i32 to index
    %c0_38 = arith.constant 0 : index
    %92 = vector.load %arg13[%91, %c0_38] : memref<64x384xf32, #tpu.memory_space<vmem>>, vector<8x384xf32>
    %93 = vector.extract_strided_slice %92 {offsets = [0, 0], sizes = [8, 128], strides = [1, 1]} : vector<8x384xf32> to vector<8x128xf32>
    %94 = vector.extract_strided_slice %90 {offsets = [0, 0], sizes = [8, 128], strides = [1, 1]} : vector<8x384xf32> to vector<8x128xf32>
    %95 = arith.addf %93, %94 : vector<8x128xf32>
    %96 = arith.negf %95 : vector<8x128xf32>
    %97 = math.exp %96 : vector<8x128xf32>
    %cst_39 = arith.constant 1.000000e+00 : f32
    %98 = vector.broadcast %cst_39 : f32 to vector<8x128xf32>
    %99 = arith.addf %98, %97 : vector<8x128xf32>
    %100 = arith.divf %98, %99 : vector<8x128xf32>
    %101 = vector.extract_strided_slice %92 {offsets = [0, 128], sizes = [8, 128], strides = [1, 1]} : vector<8x384xf32> to vector<8x128xf32>
    %102 = vector.extract_strided_slice %90 {offsets = [0, 128], sizes = [8, 128], strides = [1, 1]} : vector<8x384xf32> to vector<8x128xf32>
    %103 = arith.addf %101, %102 : vector<8x128xf32>
    %104 = arith.negf %103 : vector<8x128xf32>
    %105 = math.exp %104 : vector<8x128xf32>
    %cst_40 = arith.constant 1.000000e+00 : f32
    %106 = vector.broadcast %cst_40 : f32 to vector<8x128xf32>
    %107 = arith.addf %106, %105 : vector<8x128xf32>
    %108 = arith.divf %106, %107 : vector<8x128xf32>
    %109 = vector.extract_strided_slice %92 {offsets = [0, 256], sizes = [8, 128], strides = [1, 1]} : vector<8x384xf32> to vector<8x128xf32>
    %110 = vector.extract_strided_slice %90 {offsets = [0, 256], sizes = [8, 128], strides = [1, 1]} : vector<8x384xf32> to vector<8x128xf32>
    %111 = arith.addf %110, %19 : vector<8x128xf32>
    %112 = arith.mulf %100, %111 : vector<8x128xf32>
    %113 = arith.addf %109, %112 : vector<8x128xf32>
    %114 = math.tanh %113 : vector<8x128xf32>
    %115 = arith.subf %84, %114 : vector<8x128xf32>
    %116 = arith.mulf %108, %115 : vector<8x128xf32>
    %117 = arith.addf %114, %116 : vector<8x128xf32>
    %118 = arith.index_cast %88 : i32 to index
    %c0_41 = arith.constant 0 : index
    %119 = vector.load %arg12[%118, %c0_41] : memref<64x128xf32, #tpu.memory_space<vmem>>, vector<8x128xf32>
    tpu.vector_store %arg12[%118, %c0_41], %117 {strides = array<i32>} : memref<64x128xf32, #tpu.memory_space<vmem>>, vector<8x128xf32>,
    %c3_i32 = arith.constant 3 : i32
    %c8_i32_42 = arith.constant 8 : i32
    %120 = arith.muli %c3_i32, %c8_i32_42 : i32
    %121 = tpu.assume_multiple %120, 8 : i32
    %c0_43 = arith.constant 0 : index
    %c0_44 = arith.constant 0 : index
    %122 = vector.load %arg6[%c0_43, %c0_44] : memref<128x384xf32, #tpu.memory_space<vmem>>, vector<128x384xf32>
    %cst_45 = arith.constant dense<0.000000e+00> : vector<8x384xf32>
    %123 = tpu.matmul %117, %122, %cst_45 {dimension_numbers = #tpu.dot_dimension_numbers<[1], [0], [0], [1], [0, 0, 1, 1], [], []>} : vector<8x128xf32>, vector<128x384xf32>, vector<8x384xf32> -> vector<8x384xf32>
    %124 = arith.index_cast %121 : i32 to index
    %c0_46 = arith.constant 0 : index
    %125 = vector.load %arg13[%124, %c0_46] : memref<64x384xf32, #tpu.memory_space<vmem>>, vector<8x384xf32>
    %126 = vector.extract_strided_slice %125 {offsets = [0, 0], sizes = [8, 128], strides = [1, 1]} : vector<8x384xf32> to vector<8x128xf32>
    %127 = vector.extract_strided_slice %123 {offsets = [0, 0], sizes = [8, 128], strides = [1, 1]} : vector<8x384xf32> to vector<8x128xf32>
    %128 = arith.addf %126, %127 : vector<8x128xf32>
    %129 = arith.negf %128 : vector<8x128xf32>
    %130 = math.exp %129 : vector<8x128xf32>
    %cst_47 = arith.constant 1.000000e+00 : f32
    %131 = vector.broadcast %cst_47 : f32 to vector<8x128xf32>
    %132 = arith.addf %131, %130 : vector<8x128xf32>
    %133 = arith.divf %131, %132 : vector<8x128xf32>
    %134 = vector.extract_strided_slice %125 {offsets = [0, 128], sizes = [8, 128], strides = [1, 1]} : vector<8x384xf32> to vector<8x128xf32>
    %135 = vector.extract_strided_slice %123 {offsets = [0, 128], sizes = [8, 128], strides = [1, 1]} : vector<8x384xf32> to vector<8x128xf32>
    %136 = arith.addf %134, %135 : vector<8x128xf32>
    %137 = arith.negf %136 : vector<8x128xf32>
    %138 = math.exp %137 : vector<8x128xf32>
    %cst_48 = arith.constant 1.000000e+00 : f32
    %139 = vector.broadcast %cst_48 : f32 to vector<8x128xf32>
    %140 = arith.addf %139, %138 : vector<8x128xf32>
    %141 = arith.divf %139, %140 : vector<8x128xf32>
    %142 = vector.extract_strided_slice %125 {offsets = [0, 256], sizes = [8, 128], strides = [1, 1]} : vector<8x384xf32> to vector<8x128xf32>
    %143 = vector.extract_strided_slice %123 {offsets = [0, 256], sizes = [8, 128], strides = [1, 1]} : vector<8x384xf32> to vector<8x128xf32>
    %144 = arith.addf %143, %19 : vector<8x128xf32>
    %145 = arith.mulf %133, %144 : vector<8x128xf32>
    %146 = arith.addf %142, %145 : vector<8x128xf32>
    %147 = math.tanh %146 : vector<8x128xf32>
    %148 = arith.subf %117, %147 : vector<8x128xf32>
    %149 = arith.mulf %141, %148 : vector<8x128xf32>
    %150 = arith.addf %147, %149 : vector<8x128xf32>
    %151 = arith.index_cast %121 : i32 to index
    %c0_49 = arith.constant 0 : index
    %152 = vector.load %arg12[%151, %c0_49] : memref<64x128xf32, #tpu.memory_space<vmem>>, vector<8x128xf32>
    tpu.vector_store %arg12[%151, %c0_49], %150 {strides = array<i32>} : memref<64x128xf32, #tpu.memory_space<vmem>>, vector<8x128xf32>,
    %c4_i32 = arith.constant 4 : i32
    %c8_i32_50 = arith.constant 8 : i32
    %153 = arith.muli %c4_i32, %c8_i32_50 : i32
    %154 = tpu.assume_multiple %153, 8 : i32
    %c0_51 = arith.constant 0 : index
    %c0_52 = arith.constant 0 : index
    %155 = vector.load %arg6[%c0_51, %c0_52] : memref<128x384xf32, #tpu.memory_space<vmem>>, vector<128x384xf32>
    %cst_53 = arith.constant dense<0.000000e+00> : vector<8x384xf32>
    %156 = tpu.matmul %150, %155, %cst_53 {dimension_numbers = #tpu.dot_dimension_numbers<[1], [0], [0], [1], [0, 0, 1, 1], [], []>} : vector<8x128xf32>, vector<128x384xf32>, vector<8x384xf32> -> vector<8x384xf32>
    %157 = arith.index_cast %154 : i32 to index
    %c0_54 = arith.constant 0 : index
    %158 = vector.load %arg13[%157, %c0_54] : memref<64x384xf32, #tpu.memory_space<vmem>>, vector<8x384xf32>
    %159 = vector.extract_strided_slice %158 {offsets = [0, 0], sizes = [8, 128], strides = [1, 1]} : vector<8x384xf32> to vector<8x128xf32>
    %160 = vector.extract_strided_slice %156 {offsets = [0, 0], sizes = [8, 128], strides = [1, 1]} : vector<8x384xf32> to vector<8x128xf32>
    %161 = arith.addf %159, %160 : vector<8x128xf32>
    %162 = arith.negf %161 : vector<8x128xf32>
    %163 = math.exp %162 : vector<8x128xf32>
    %cst_55 = arith.constant 1.000000e+00 : f32
    %164 = vector.broadcast %cst_55 : f32 to vector<8x128xf32>
    %165 = arith.addf %164, %163 : vector<8x128xf32>
    %166 = arith.divf %164, %165 : vector<8x128xf32>
    %167 = vector.extract_strided_slice %158 {offsets = [0, 128], sizes = [8, 128], strides = [1, 1]} : vector<8x384xf32> to vector<8x128xf32>
    %168 = vector.extract_strided_slice %156 {offsets = [0, 128], sizes = [8, 128], strides = [1, 1]} : vector<8x384xf32> to vector<8x128xf32>
    %169 = arith.addf %167, %168 : vector<8x128xf32>
    %170 = arith.negf %169 : vector<8x128xf32>
    %171 = math.exp %170 : vector<8x128xf32>
    %cst_56 = arith.constant 1.000000e+00 : f32
    %172 = vector.broadcast %cst_56 : f32 to vector<8x128xf32>
    %173 = arith.addf %172, %171 : vector<8x128xf32>
    %174 = arith.divf %172, %173 : vector<8x128xf32>
    %175 = vector.extract_strided_slice %158 {offsets = [0, 256], sizes = [8, 128], strides = [1, 1]} : vector<8x384xf32> to vector<8x128xf32>
    %176 = vector.extract_strided_slice %156 {offsets = [0, 256], sizes = [8, 128], strides = [1, 1]} : vector<8x384xf32> to vector<8x128xf32>
    %177 = arith.addf %176, %19 : vector<8x128xf32>
    %178 = arith.mulf %166, %177 : vector<8x128xf32>
    %179 = arith.addf %175, %178 : vector<8x128xf32>
    %180 = math.tanh %179 : vector<8x128xf32>
    %181 = arith.subf %150, %180 : vector<8x128xf32>
    %182 = arith.mulf %174, %181 : vector<8x128xf32>
    %183 = arith.addf %180, %182 : vector<8x128xf32>
    %184 = arith.index_cast %154 : i32 to index
    %c0_57 = arith.constant 0 : index
    %185 = vector.load %arg12[%184, %c0_57] : memref<64x128xf32, #tpu.memory_space<vmem>>, vector<8x128xf32>
    tpu.vector_store %arg12[%184, %c0_57], %183 {strides = array<i32>} : memref<64x128xf32, #tpu.memory_space<vmem>>, vector<8x128xf32>,
    %c5_i32 = arith.constant 5 : i32
    %c8_i32_58 = arith.constant 8 : i32
    %186 = arith.muli %c5_i32, %c8_i32_58 : i32
    %187 = tpu.assume_multiple %186, 8 : i32
    %c0_59 = arith.constant 0 : index
    %c0_60 = arith.constant 0 : index
    %188 = vector.load %arg6[%c0_59, %c0_60] : memref<128x384xf32, #tpu.memory_space<vmem>>, vector<128x384xf32>
    %cst_61 = arith.constant dense<0.000000e+00> : vector<8x384xf32>
    %189 = tpu.matmul %183, %188, %cst_61 {dimension_numbers = #tpu.dot_dimension_numbers<[1], [0], [0], [1], [0, 0, 1, 1], [], []>} : vector<8x128xf32>, vector<128x384xf32>, vector<8x384xf32> -> vector<8x384xf32>
    %190 = arith.index_cast %187 : i32 to index
    %c0_62 = arith.constant 0 : index
    %191 = vector.load %arg13[%190, %c0_62] : memref<64x384xf32, #tpu.memory_space<vmem>>, vector<8x384xf32>
    %192 = vector.extract_strided_slice %191 {offsets = [0, 0], sizes = [8, 128], strides = [1, 1]} : vector<8x384xf32> to vector<8x128xf32>
    %193 = vector.extract_strided_slice %189 {offsets = [0, 0], sizes = [8, 128], strides = [1, 1]} : vector<8x384xf32> to vector<8x128xf32>
    %194 = arith.addf %192, %193 : vector<8x128xf32>
    %195 = arith.negf %194 : vector<8x128xf32>
    %196 = math.exp %195 : vector<8x128xf32>
    %cst_63 = arith.constant 1.000000e+00 : f32
    %197 = vector.broadcast %cst_63 : f32 to vector<8x128xf32>
    %198 = arith.addf %197, %196 : vector<8x128xf32>
    %199 = arith.divf %197, %198 : vector<8x128xf32>
    %200 = vector.extract_strided_slice %191 {offsets = [0, 128], sizes = [8, 128], strides = [1, 1]} : vector<8x384xf32> to vector<8x128xf32>
    %201 = vector.extract_strided_slice %189 {offsets = [0, 128], sizes = [8, 128], strides = [1, 1]} : vector<8x384xf32> to vector<8x128xf32>
    %202 = arith.addf %200, %201 : vector<8x128xf32>
    %203 = arith.negf %202 : vector<8x128xf32>
    %204 = math.exp %203 : vector<8x128xf32>
    %cst_64 = arith.constant 1.000000e+00 : f32
    %205 = vector.broadcast %cst_64 : f32 to vector<8x128xf32>
    %206 = arith.addf %205, %204 : vector<8x128xf32>
    %207 = arith.divf %205, %206 : vector<8x128xf32>
    %208 = vector.extract_strided_slice %191 {offsets = [0, 256], sizes = [8, 128], strides = [1, 1]} : vector<8x384xf32> to vector<8x128xf32>
    %209 = vector.extract_strided_slice %189 {offsets = [0, 256], sizes = [8, 128], strides = [1, 1]} : vector<8x384xf32> to vector<8x128xf32>
    %210 = arith.addf %209, %19 : vector<8x128xf32>
    %211 = arith.mulf %199, %210 : vector<8x128xf32>
    %212 = arith.addf %208, %211 : vector<8x128xf32>
    %213 = math.tanh %212 : vector<8x128xf32>
    %214 = arith.subf %183, %213 : vector<8x128xf32>
    %215 = arith.mulf %207, %214 : vector<8x128xf32>
    %216 = arith.addf %213, %215 : vector<8x128xf32>
    %217 = arith.index_cast %187 : i32 to index
    %c0_65 = arith.constant 0 : index
    %218 = vector.load %arg12[%217, %c0_65] : memref<64x128xf32, #tpu.memory_space<vmem>>, vector<8x128xf32>
    tpu.vector_store %arg12[%217, %c0_65], %216 {strides = array<i32>} : memref<64x128xf32, #tpu.memory_space<vmem>>, vector<8x128xf32>,
    %c6_i32 = arith.constant 6 : i32
    %c8_i32_66 = arith.constant 8 : i32
    %219 = arith.muli %c6_i32, %c8_i32_66 : i32
    %220 = tpu.assume_multiple %219, 8 : i32
    %c0_67 = arith.constant 0 : index
    %c0_68 = arith.constant 0 : index
    %221 = vector.load %arg6[%c0_67, %c0_68] : memref<128x384xf32, #tpu.memory_space<vmem>>, vector<128x384xf32>
    %cst_69 = arith.constant dense<0.000000e+00> : vector<8x384xf32>
    %222 = tpu.matmul %216, %221, %cst_69 {dimension_numbers = #tpu.dot_dimension_numbers<[1], [0], [0], [1], [0, 0, 1, 1], [], []>} : vector<8x128xf32>, vector<128x384xf32>, vector<8x384xf32> -> vector<8x384xf32>
    %223 = arith.index_cast %220 : i32 to index
    %c0_70 = arith.constant 0 : index
    %224 = vector.load %arg13[%223, %c0_70] : memref<64x384xf32, #tpu.memory_space<vmem>>, vector<8x384xf32>
    %225 = vector.extract_strided_slice %224 {offsets = [0, 0], sizes = [8, 128], strides = [1, 1]} : vector<8x384xf32> to vector<8x128xf32>
    %226 = vector.extract_strided_slice %222 {offsets = [0, 0], sizes = [8, 128], strides = [1, 1]} : vector<8x384xf32> to vector<8x128xf32>
    %227 = arith.addf %225, %226 : vector<8x128xf32>
    %228 = arith.negf %227 : vector<8x128xf32>
    %229 = math.exp %228 : vector<8x128xf32>
    %cst_71 = arith.constant 1.000000e+00 : f32
    %230 = vector.broadcast %cst_71 : f32 to vector<8x128xf32>
    %231 = arith.addf %230, %229 : vector<8x128xf32>
    %232 = arith.divf %230, %231 : vector<8x128xf32>
    %233 = vector.extract_strided_slice %224 {offsets = [0, 128], sizes = [8, 128], strides = [1, 1]} : vector<8x384xf32> to vector<8x128xf32>
    %234 = vector.extract_strided_slice %222 {offsets = [0, 128], sizes = [8, 128], strides = [1, 1]} : vector<8x384xf32> to vector<8x128xf32>
    %235 = arith.addf %233, %234 : vector<8x128xf32>
    %236 = arith.negf %235 : vector<8x128xf32>
    %237 = math.exp %236 : vector<8x128xf32>
    %cst_72 = arith.constant 1.000000e+00 : f32
    %238 = vector.broadcast %cst_72 : f32 to vector<8x128xf32>
    %239 = arith.addf %238, %237 : vector<8x128xf32>
    %240 = arith.divf %238, %239 : vector<8x128xf32>
    %241 = vector.extract_strided_slice %224 {offsets = [0, 256], sizes = [8, 128], strides = [1, 1]} : vector<8x384xf32> to vector<8x128xf32>
    %242 = vector.extract_strided_slice %222 {offsets = [0, 256], sizes = [8, 128], strides = [1, 1]} : vector<8x384xf32> to vector<8x128xf32>
    %243 = arith.addf %242, %19 : vector<8x128xf32>
    %244 = arith.mulf %232, %243 : vector<8x128xf32>
    %245 = arith.addf %241, %244 : vector<8x128xf32>
    %246 = math.tanh %245 : vector<8x128xf32>
    %247 = arith.subf %216, %246 : vector<8x128xf32>
    %248 = arith.mulf %240, %247 : vector<8x128xf32>
    %249 = arith.addf %246, %248 : vector<8x128xf32>
    %250 = arith.index_cast %220 : i32 to index
    %c0_73 = arith.constant 0 : index
    %251 = vector.load %arg12[%250, %c0_73] : memref<64x128xf32, #tpu.memory_space<vmem>>, vector<8x128xf32>
    tpu.vector_store %arg12[%250, %c0_73], %249 {strides = array<i32>} : memref<64x128xf32, #tpu.memory_space<vmem>>, vector<8x128xf32>,
    %c7_i32 = arith.constant 7 : i32
    %c8_i32_74 = arith.constant 8 : i32
    %252 = arith.muli %c7_i32, %c8_i32_74 : i32
    %253 = tpu.assume_multiple %252, 8 : i32
    %c0_75 = arith.constant 0 : index
    %c0_76 = arith.constant 0 : index
    %254 = vector.load %arg6[%c0_75, %c0_76] : memref<128x384xf32, #tpu.memory_space<vmem>>, vector<128x384xf32>
    %cst_77 = arith.constant dense<0.000000e+00> : vector<8x384xf32>
    %255 = tpu.matmul %249, %254, %cst_77 {dimension_numbers = #tpu.dot_dimension_numbers<[1], [0], [0], [1], [0, 0, 1, 1], [], []>} : vector<8x128xf32>, vector<128x384xf32>, vector<8x384xf32> -> vector<8x384xf32>
    %256 = arith.index_cast %253 : i32 to index
    %c0_78 = arith.constant 0 : index
    %257 = vector.load %arg13[%256, %c0_78] : memref<64x384xf32, #tpu.memory_space<vmem>>, vector<8x384xf32>
    %258 = vector.extract_strided_slice %257 {offsets = [0, 0], sizes = [8, 128], strides = [1, 1]} : vector<8x384xf32> to vector<8x128xf32>
    %259 = vector.extract_strided_slice %255 {offsets = [0, 0], sizes = [8, 128], strides = [1, 1]} : vector<8x384xf32> to vector<8x128xf32>
    %260 = arith.addf %258, %259 : vector<8x128xf32>
    %261 = arith.negf %260 : vector<8x128xf32>
    %262 = math.exp %261 : vector<8x128xf32>
    %cst_79 = arith.constant 1.000000e+00 : f32
    %263 = vector.broadcast %cst_79 : f32 to vector<8x128xf32>
    %264 = arith.addf %263, %262 : vector<8x128xf32>
    %265 = arith.divf %263, %264 : vector<8x128xf32>
    %266 = vector.extract_strided_slice %257 {offsets = [0, 128], sizes = [8, 128], strides = [1, 1]} : vector<8x384xf32> to vector<8x128xf32>
    %267 = vector.extract_strided_slice %255 {offsets = [0, 128], sizes = [8, 128], strides = [1, 1]} : vector<8x384xf32> to vector<8x128xf32>
    %268 = arith.addf %266, %267 : vector<8x128xf32>
    %269 = arith.negf %268 : vector<8x128xf32>
    %270 = math.exp %269 : vector<8x128xf32>
    %cst_80 = arith.constant 1.000000e+00 : f32
    %271 = vector.broadcast %cst_80 : f32 to vector<8x128xf32>
    %272 = arith.addf %271, %270 : vector<8x128xf32>
    %273 = arith.divf %271, %272 : vector<8x128xf32>
    %274 = vector.extract_strided_slice %257 {offsets = [0, 256], sizes = [8, 128], strides = [1, 1]} : vector<8x384xf32> to vector<8x128xf32>
    %275 = vector.extract_strided_slice %255 {offsets = [0, 256], sizes = [8, 128], strides = [1, 1]} : vector<8x384xf32> to vector<8x128xf32>
    %276 = arith.addf %275, %19 : vector<8x128xf32>
    %277 = arith.mulf %265, %276 : vector<8x128xf32>
    %278 = arith.addf %274, %277 : vector<8x128xf32>
    %279 = math.tanh %278 : vector<8x128xf32>
    %280 = arith.subf %249, %279 : vector<8x128xf32>
    %281 = arith.mulf %273, %280 : vector<8x128xf32>
    %282 = arith.addf %279, %281 : vector<8x128xf32>
    %283 = arith.index_cast %253 : i32 to index
    %c0_81 = arith.constant 0 : index
    %284 = vector.load %arg12[%283, %c0_81] : memref<64x128xf32, #tpu.memory_space<vmem>>, vector<8x128xf32>
    tpu.vector_store %arg12[%283, %c0_81], %282 {strides = array<i32>} : memref<64x128xf32, #tpu.memory_space<vmem>>, vector<8x128xf32>,
    %c8_i32_82 = arith.constant 8 : i32
    %c0_83 = arith.constant 0 : index
    %c0_84 = arith.constant 0 : index
    %285 = vector.load %arg11[%c0_83, %c0_84] : memref<8x128xf32, #tpu.memory_space<vmem>>, vector<8x128xf32>
    tpu.vector_store %arg11[%c0_83, %c0_84], %282 {strides = array<i32>} : memref<8x128xf32, #tpu.memory_space<vmem>>, vector<8x128xf32>,
    %c0_85 = arith.constant 0 : index
    %c0_86 = arith.constant 0 : index
    %286 = vector.load %arg12[%c0_85, %c0_86] : memref<64x128xf32, #tpu.memory_space<vmem>>, vector<64x128xf32>
    %c0_87 = arith.constant 0 : index
    %c0_88 = arith.constant 0 : index
    %287 = vector.load %arg8[%c0_87, %c0_88] : memref<128x128xf32, #tpu.memory_space<vmem>>, vector<128x128xf32>
    %cst_89 = arith.constant dense<0.000000e+00> : vector<64x128xf32>
    %288 = tpu.matmul %286, %287, %cst_89 {dimension_numbers = #tpu.dot_dimension_numbers<[1], [0], [0], [1], [0, 0, 1, 1], [], []>} : vector<64x128xf32>, vector<128x128xf32>, vector<64x128xf32> -> vector<64x128xf32>
    %c0_90 = arith.constant 0 : index
    %c0_91 = arith.constant 0 : index
    %289 = vector.load %arg9[%c0_90, %c0_91] : memref<1x128xf32, #tpu.memory_space<vmem>>, vector<1x128xf32>
    %290 = vector.broadcast %289 : vector<1x128xf32> to vector<64x128xf32>
    %291 = arith.addf %288, %290 : vector<64x128xf32>
    %c0_92 = arith.constant 0 : index
    %c0_93 = arith.constant 0 : index
    %292 = vector.load %arg10[%c0_92, %c0_93] : memref<64x128xf32, #tpu.memory_space<vmem>>, vector<64x128xf32>
    tpu.vector_store %arg10[%c0_92, %c0_93], %291 {strides = array<i32>} : memref<64x128xf32, #tpu.memory_space<vmem>>, vector<64x128xf32>,
    return
  }
  func.func @transform_0(%arg0: i32) -> (i32, i32) {
    %c0_i32 = arith.constant 0 : i32
    %c0_i32_0 = arith.constant 0 : i32
    return %arg0, %c0_i32 : i32, i32
  }
  func.func @transform_1(%arg0: i32) -> (i32, i32) {
    %c0_i32 = arith.constant 0 : i32
    %c0_i32_0 = arith.constant 0 : i32
    %c0_i32_1 = arith.constant 0 : i32
    return %c0_i32, %c0_i32_0 : i32, i32
  }
  func.func @transform_2(%arg0: i32) -> (i32, i32) {
    %c0_i32 = arith.constant 0 : i32
    %c0_i32_0 = arith.constant 0 : i32
    %c0_i32_1 = arith.constant 0 : i32
    return %c0_i32, %c0_i32_0 : i32, i32
  }
  func.func @transform_3(%arg0: i32) -> (i32, i32) {
    %c0_i32 = arith.constant 0 : i32
    %c0_i32_0 = arith.constant 0 : i32
    %c0_i32_1 = arith.constant 0 : i32
    return %c0_i32, %c0_i32_0 : i32, i32
  }
  func.func @transform_4(%arg0: i32) -> (i32, i32) {
    %c0_i32 = arith.constant 0 : i32
    %c0_i32_0 = arith.constant 0 : i32
    %c0_i32_1 = arith.constant 0 : i32
    return %c0_i32, %c0_i32_0 : i32, i32
  }
  func.func @transform_5(%arg0: i32) -> (i32, i32) {
    %c0_i32 = arith.constant 0 : i32
    %c0_i32_0 = arith.constant 0 : i32
    %c0_i32_1 = arith.constant 0 : i32
    return %c0_i32, %c0_i32_0 : i32, i32
  }
  func.func @transform_6(%arg0: i32) -> (i32, i32) {
    %c0_i32 = arith.constant 0 : i32
    %c0_i32_0 = arith.constant 0 : i32
    %c0_i32_1 = arith.constant 0 : i32
    return %c0_i32, %c0_i32_0 : i32, i32
  }
  func.func @transform_7(%arg0: i32) -> (i32, i32) {
    %c0_i32 = arith.constant 0 : i32
    %c0_i32_0 = arith.constant 0 : i32
    %c0_i32_1 = arith.constant 0 : i32
    return %c0_i32, %c0_i32_0 : i32, i32
  }
  func.func @transform_8(%arg0: i32) -> (i32, i32) {
    %c0_i32 = arith.constant 0 : i32
    %c0_i32_0 = arith.constant 0 : i32
    %c0_i32_1 = arith.constant 0 : i32
    return %c0_i32, %c0_i32_0 : i32, i32
  }
  func.func @transform_9(%arg0: i32) -> (i32, i32) {
    %c0_i32 = arith.constant 0 : i32
    %c0_i32_0 = arith.constant 0 : i32
    return %arg0, %c0_i32 : i32, i32
  }
}

</mosaic_0001>

<bundles_post_ra>
// kernel: rnn_forward.1
= control target key start
LH: loop header
LB: loop body
LE: loop exit
PB: predicated region body
PF: predicated region fallthrough
CT: control target
= control target key end

     0   :  { %vm54_vm0 = vcmask 130048   ;;  %vm3095_vm1 = vmmov 0   ;;  %s4659_s1 = inlined_call_operand.vmem [shape: f32[16,128], index: 1, kind: input, shape index: {}]   ;;  %s4660_s0 = inlined_call_operand.vmem [shape: f32[64,16], index: 0, kind: input, shape index: {}]   ;;  %s4661_s3 = inlined_call_operand.vmem [shape: f32[128,384], index: 3, kind: input, shape index: {}]   ;;  %s4662_s5 = inlined_call_operand.vmem [shape: f32[128,384], index: 5, kind: input, shape index: {}]   ;;  %s4663_s2 = inlined_call_operand.vmem [shape: f32[1,128], index: 2, kind: input, shape index: {}]   ;;  %s4664_s4 = inlined_call_operand.vmem [shape: f32[1,384], index: 4, kind: input, shape index: {}]   ;;  %s4665_s6 = inlined_call_operand.vmem [shape: f32[1,128], index: 6, kind: input, shape index: {}]   ;;  %s4666_s7 = inlined_call_operand.vmem [shape: f32[128,128], index: 7, kind: input, shape index: {}]   ;;  %s4667_s8 = inlined_call_operand.vmem [shape: f32[1,128], index: 8, kind: input, shape index: {}]   ;;  %s4668_s9 = inlined_call_operand.vmem [shape: f32[64,128], index: 9, kind: output, shape index: {}]  }
   0x1   :  { %v46_v0 = vld [vmem:[%s4659_s1 + $0x8] sm:$0xff]  ;;  %v45_v1 = vld [vmem:[%s4659_s1] sm:$0xff]  ;;  %v39_v4 = vld [vmem:[%s4660_s0 + $0x10] sm:$0xff] }
   0x2   :  { %v37_v2 = vld [vmem:[%s4660_s0] sm:$0xff]  ;;  %2627 = vmatprep.subr.mxu1 %v46_v0  ;;  %v38_v3 = vld [vmem:[%s4660_s0 + $0x8] sm:$0xff]  ;;  %v238_v5 = vld [vmem:[%s4661_s3 + $0x170] sm:$0xff] }
   0x3   :  { %2631 = vmatprep.mubr.msk.f32.mxu1 %vm54_vm0, %v37_v2  ;;  %2628 = vmatpush3.msra.mxu1 %v46_v0  ;;  %v237_v6 = vld [vmem:[%s4661_s3 + $0x168] sm:$0xff]  ;;  %v235_v7 = vld [vmem:[%s4661_s3 + $0x158] sm:$0xff]  ;;  %v234_v8 = vld [vmem:[%s4661_s3 + $0x150] sm:$0xff] }
   0x4   :  { %2629 = vmatprep.subr.mxu1 %v45_v1  ;;  %257 = vmatprep.subr.mxu0 %v238_v5  ;;  %v3177_v9 = vld [vmem:[%s4662_s5 + $0x170] sm:$0xff]  ;;  %v232_v10 = vld [vmem:[%s4661_s3 + $0x140] sm:$0xff]  ;;  %v3186_v11 = vld [vmem:[%s4662_s5 + $0x168] sm:$0xff] }
   0x5   :  { %2630 = vmatpush3.msra.mxu1 %v45_v1  ;;  %258 = vmatpush1.msra.mxu0 %v237_v6  ;;  %v40_v12 = vld [vmem:[%s4660_s0 + $0x18] sm:$0xff]  ;;  %v41_v14 = vld [vmem:[%s4660_s0 + $0x20] sm:$0xff]  ;;  %v229_v16 = vld [vmem:[%s4661_s3 + $0x128] sm:$0xff] }
   0x6   :  { %2632 = vmatmul.mubr.msk.f32.vlgmr.msra.gmra.mxu1 %vm54_vm0, %v38_v3  ;;  %259 = vmatprep.subr.mxu0 %v235_v7  ;;  %v231_v13 = vld [vmem:[%s4661_s3 + $0x138] sm:$0xff]  ;;  %v3211_v17 = vld [vmem:[%s4662_s5 + $0x150] sm:$0xff]  ;;  %v228_v18 = vld [vmem:[%s4661_s3 + $0x120] sm:$0xff] }
   0x7   :  { %2634 = vmatprep.mubr.msk.f32.mxu1 %vm54_vm0, %v39_v4  ;;  %260 = vmatpush1.msra.mxu0 %v234_v8  ;;  %v3202_v15 = vld [vmem:[%s4662_s5 + $0x158] sm:$0xff]  ;;  %v3220_v19 = vld [vmem:[%s4662_s5 + $0x140] sm:$0xff]  ;;  %v42_v20 = vld [vmem:[%s4660_s0 + $0x28] sm:$0xff] }
   0x8   :  { %555 = vmatprep.subr.mxu1 %v3177_v9  ;;  %261 = vmatprep.subr.mxu0 %v232_v10  ;;  %v226_v21 = vld [vmem:[%s4661_s3 + $0x110] sm:$0xff]  ;;  %v3237_v23 = vld [vmem:[%s4662_s5 + $0x138] sm:$0xff]  ;;  %v225_v24 = vld [vmem:[%s4661_s3 + $0x108] sm:$0xff]  ;;  %v4669_v10 = vmov 0.0  }
   0x9   :  { %556 = vmatpush1.msra.mxu1 %v3186_v11  ;;  %262 = vmatpush1.msra.mxu0 %v231_v13  ;;  %v43_v22 = vld [vmem:[%s4660_s0 + $0x30] sm:$0xff]  ;;  %v3246_v25 = vld [vmem:[%s4662_s5 + $0x128] sm:$0xff]  ;;  %v223_v26 = vld [vmem:[%s4661_s3 + $0xf8] sm:$0xff] }
   0xa   :  { %2635 = vmatmul.mubr.msk.f32.gmra.mxu1 %vm54_vm0, %v40_v12  ;;  %557 = vmatprep.subr.mxu1 %v3202_v15  ;;  %v3255_v27 = vld [vmem:[%s4662_s5 + $0x120] sm:$0xff]  ;;  %v44_v28 = vld [vmem:[%s4660_s0 + $0x38] sm:$0xff]  ;;  %v222_v29 = vld [vmem:[%s4661_s3 + $0xf0] sm:$0xff] }
   0xb   :  { %2637 = vmatprep.mubr.msk.f32.mxu1 %vm54_vm0, %v41_v14  ;;  %263 = vmatprep.subr.mxu0 %v229_v16  ;;  %v3269_v30 = vld [vmem:[%s4662_s5 + $0x110] sm:$0xff]  ;;  %v220_v31 = vld [vmem:[%s4661_s3 + $0xe0] sm:$0xff]  ;;  %v3278_v32 = vld [vmem:[%s4662_s5 + $0x108] sm:$0xff] }
   0xc   :  { %558 = vmatpush1.msra.mxu1 %v3211_v17  ;;  %264 = vmatpush1.msra.mxu0 %v228_v18  ;;  %v219_v33 = vld [vmem:[%s4661_s3 + $0xd8] sm:$0xff]  ;;  %v217_v35 = vld [vmem:[%s4661_s3 + $0xc8] sm:$0xff]  ;;  %v3296_v36 = vld [vmem:[%s4662_s5 + $0xf0] sm:$0xff] }
   0xd   :  { %559 = vmatprep.subr.mxu1 %v3220_v19  ;;  %265 = vmatprep.subr.mxu0 %v226_v21  ;;  %v3287_v34 = vld [vmem:[%s4662_s5 + $0xf8] sm:$0xff]  ;;  %v216_v37 = vld [vmem:[%s4661_s3 + $0xc0] sm:$0xff]  ;;  %v214_v39 = vld [vmem:[%s4661_s3 + $0xb0] sm:$0xff] }
   0xe   :  { %2638 = vmatmul.mubr.msk.f32.gmra.mxu1 %vm54_vm0, %v42_v20  ;;  %266 = vmatpush1.msra.mxu0 %v225_v24  ;;  %v3305_v38 = vld [vmem:[%s4662_s5 + $0xe0] sm:$0xff]  ;;  %v3314_v40 = vld [vmem:[%s4662_s5 + $0xd8] sm:$0xff]  ;;  %v213_v41 = vld [vmem:[%s4661_s3 + $0xa8] sm:$0xff] }
   0xf   :  { %2640 = vmatprep.mubr.msk.f32.mxu1 %vm54_vm0, %v43_v22  ;;  %560 = vmatpush1.msra.mxu1 %v3237_v23  ;;  %v3323_v42 = vld [vmem:[%s4662_s5 + $0xc8] sm:$0xff]  ;;  %v211_v43 = vld [vmem:[%s4661_s3 + $0x98] sm:$0xff]  ;;  %v3332_v44 = vld [vmem:[%s4662_s5 + $0xc0] sm:$0xff] }
  0x10   :  { %561 = vmatprep.subr.mxu1 %v3246_v25  ;;  %267 = vmatprep.subr.mxu0 %v223_v26  ;;  %v210_v45 = vld [vmem:[%s4661_s3 + $0x90] sm:$0xff]  ;;  %v208_v47 = vld [vmem:[%s4661_s3 + $0x80] sm:$0xff]  ;;  %v3350_v48 = vld [vmem:[%s4662_s5 + $0xa8] sm:$0xff] }
  0x11   :  { %562 = vmatpush1.msra.mxu1 %v3255_v27  ;;  %268 = vmatpush1.msra.mxu0 %v222_v29  ;;  %v3341_v46 = vld [vmem:[%s4662_s5 + $0xb0] sm:$0xff]  ;;  %v207_v49 = vld [vmem:[%s4661_s3 + $0x78] sm:$0xff]  ;;  %v205_v51 = vld [vmem:[%s4661_s3 + $0x68] sm:$0xff] }
  0x12   :  { %2641 = vmatmul.mubr.msk.f32.gmra.mxu1 %vm54_vm0, %v44_v28  ;;  %563 = vmatprep.subr.mxu1 %v3269_v30  ;;  %v3359_v50 = vld [vmem:[%s4662_s5 + $0x98] sm:$0xff]  ;;  %v3368_v52 = vld [vmem:[%s4662_s5 + $0x90] sm:$0xff]  ;;  %v204_v53 = vld [vmem:[%s4661_s3 + $0x60] sm:$0xff] }
  0x13   :  { %269 = vmatprep.subr.mxu0 %v220_v31  ;;  %564 = vmatpush1.msra.mxu1 %v3278_v32  ;;  %v3377_v54 = vld [vmem:[%s4662_s5 + $0x80] sm:$0xff]  ;;  %v202_v55 = vld [vmem:[%s4661_s3 + $0x50] sm:$0xff]  ;;  %v3386_v56 = vld [vmem:[%s4662_s5 + $0x78] sm:$0xff] }
  0x14   :  { %270 = vmatpush1.msra.mxu0 %v219_v33  ;;  %565 = vmatprep.subr.mxu1 %v3287_v34  ;;  %v201_v57 = vld [vmem:[%s4661_s3 + $0x48] sm:$0xff]  ;;  %v199_v59 = vld [vmem:[%s4661_s3 + $0x38] sm:$0xff]  ;;  %v3406_v60 = vld [vmem:[%s4662_s5 + $0x60] sm:$0xff] }
  0x15   :  { %271 = vmatprep.subr.mxu0 %v217_v35  ;;  %566 = vmatpush1.msra.mxu1 %v3296_v36  ;;  %v3395_v58 = vld [vmem:[%s4662_s5 + $0x68] sm:$0xff]  ;;  %v198_v61 = vld [vmem:[%s4661_s3 + $0x30] sm:$0xff]  ;;  %v196_v63 = vld [vmem:[%s4661_s3 + $0x20] sm:$0xff] }
  0x16   :  { %272 = vmatpush1.msra.mxu0 %v216_v37  ;;  %567 = vmatprep.subr.mxu1 %v3305_v38  ;;  %v3415_v62 = vld [vmem:[%s4662_s5 + $0x50] sm:$0xff]  ;;  %v3424_v0 = vld [vmem:[%s4662_s5 + $0x48] sm:$0xff]  ;;  %v195_v1 = vld [vmem:[%s4661_s3 + $0x18] sm:$0xff] }
  0x17   :  { %273 = vmatprep.subr.mxu0 %v214_v39  ;;  %568 = vmatpush1.msra.mxu1 %v3314_v40  ;;  %v3433_v2 = vld [vmem:[%s4662_s5 + $0x38] sm:$0xff]  ;;  %v193_v3 = vld [vmem:[%s4661_s3 + $0x8] sm:$0xff]  ;;  %v3442_v4 = vld [vmem:[%s4662_s5 + $0x30] sm:$0xff] }
  0x18   :  { %274 = vmatpush1.msra.mxu0 %v213_v41  ;;  %569 = vmatprep.subr.mxu1 %v3323_v42  ;;  %v192_v5 = vld [vmem:[%s4661_s3] sm:$0xff]  ;;  %v239_v7 = vld [vmem:[%s4661_s3 + $0x178] sm:$0xff]  ;;  %v3467_v12 = vld [vmem:[%s4662_s5 + $0x8] sm:$0xff] }
  0x19   :  { %275 = vmatprep.subr.mxu0 %v211_v43  ;;  %570 = vmatpush1.msra.mxu1 %v3332_v44  ;;  %v3451_v6 = vld [vmem:[%s4662_s5 + $0x20] sm:$0xff]  ;;  %v3460_v8 = vld [vmem:[%s4662_s5 + $0x18] sm:$0xff]  ;;  %4693 = vst [vmem:[#allocation6_spill] sm:$0xff] %v3467_v12  ;;  %v233_v28 = vld [vmem:[%s4661_s3 + $0x148] sm:$0xff] }
  0x1a   :  { %276 = vmatpush1.msra.mxu0 %v210_v45  ;;  %571 = vmatprep.subr.mxu1 %v3341_v46  ;;  %4692 = vst [vmem:[#allocation5_spill] sm:$0xff] %v3460_v8  ;;  %v3474_v13 = vld [vmem:[%s4662_s5] sm:$0xff]  ;;  %v230_v33 = vld [vmem:[%s4661_s3 + $0x130] sm:$0xff]  ;;  %v227_v37 = vld [vmem:[%s4661_s3 + $0x118] sm:$0xff] }
  0x1b   :  { %277 = vmatprep.subr.mxu0 %v208_v47  ;;  %572 = vmatpush1.msra.mxu1 %v3350_v48  ;;  %4694 = vst [vmem:[#allocation7_spill] sm:$0xff] %v3474_v13  ;;  %v3515_v16 = vld [vmem:[%s4663_s2] ss:$0 sm:$0xff]  ;;  %v221_v47 = vld [vmem:[%s4661_s3 + $0xe8] sm:$0xff] }
  0x1c   :  { %278 = vmatpush1.msra.mxu0 %v207_v49  ;;  %573 = vmatprep.subr.mxu1 %v3359_v50  ;;  %v224_v45 = vld [vmem:[%s4661_s3 + $0x100] sm:$0xff] }
  0x1d   :  { %279 = vmatprep.subr.mxu0 %v205_v51  ;;  %574 = vmatpush1.msra.mxu1 %v3368_v52 }
  0x1e   :  { %280 = vmatpush1.msra.mxu0 %v204_v53  ;;  %575 = vmatprep.subr.mxu1 %v3377_v54  ;;  %v218_v53 = vld [vmem:[%s4661_s3 + $0xd0] sm:$0xff] }
  0x1f   :  { %281 = vmatprep.subr.mxu0 %v202_v55  ;;  %576 = vmatpush1.msra.mxu1 %v3386_v56 }
  0x20   :  { %282 = vmatpush1.msra.mxu0 %v201_v57  ;;  %577 = vmatprep.subr.mxu1 %v3395_v58  ;;  %v215_v57 = vld [vmem:[%s4661_s3 + $0xb8] sm:$0xff] }
  0x21   :  { %283 = vmatprep.subr.mxu0 %v199_v59  ;;  %578 = vmatpush1.msra.mxu1 %v3406_v60 }
  0x22   :  { %284 = vmatpush1.msra.mxu0 %v198_v61  ;;  %579 = vmatprep.subr.mxu1 %v3415_v62 }
  0x23   :  { %285 = vmatprep.subr.mxu0 %v196_v63  ;;  %580 = vmatpush1.msra.mxu1 %v3424_v0 }
  0x24   :  { %286 = vmatpush1.msra.mxu0 %v195_v1  ;;  %581 = vmatprep.subr.mxu1 %v3433_v2  ;;  %v212_v1 = vld [vmem:[%s4661_s3 + $0xa0] sm:$0xff] }
  0x25   :  { %287 = vmatprep.subr.mxu0 %v193_v3  ;;  %582 = vmatpush1.msra.mxu1 %v3442_v4  ;;  %v209_v3 = vld [vmem:[%s4661_s3 + $0x88] sm:$0xff] }
  0x26   :  { %288 = vmatpush1.msra.mxu0 %v192_v5  ;;  %583 = vmatprep.subr.mxu1 %v3451_v6 }
  0x27   :  { %321 = vmatprep.mubr.f32.mxu0 %v4669_v10  ;;  %2643 = vmatprep.subr.mxu0 %v239_v7 }
  0x28   :  { %584 = vmatpush1.msra.mxu1 %v3460_v8  ;;  %619 = vmatprep.mubr.f32.mxu1 %v4669_v10 }
  0x29   :  { %585 = vmatprep.subr.mxu1 %v3467_v12 }
  0x2a   :  { %586 = vmatpush1.msra.mxu1 %v3474_v13 }
  0x2b   :  { %620 = vmatmul.mubr.f32.vlgmr.msra.gmra.mxu1 %v4669_v10  ;;  %772 = vmatprep.subr.mxu1 %v3177_v9 }
  0x2c   :  { %773 = vmatpush1.msra.mxu1 %v3186_v11  ;;  %836 = vmatprep.mubr.f32.mxu1 %v4669_v10 }
  0x2d   :  { %774 = vmatprep.subr.mxu1 %v3202_v15 }
  0x2e   :  { %775 = vmatpush1.msra.mxu1 %v3211_v17 }
  0x2f   :  { %776 = vmatprep.subr.mxu1 %v3220_v19 }
  0x30   :  { %777 = vmatpush1.msra.mxu1 %v3237_v23 }
  0x31   :  { %778 = vmatprep.subr.mxu1 %v3246_v25 }
  0x32   :  { %779 = vmatpush1.msra.mxu1 %v3255_v27 }
  0x33   :  { %780 = vmatprep.subr.mxu1 %v3269_v30 }
  0x34   :  { %781 = vmatpush1.msra.mxu1 %v3278_v32 }
  0x35   :  { %782 = vmatprep.subr.mxu1 %v3287_v34 }
  0x36   :  { %783 = vmatpush1.msra.mxu1 %v3296_v36 }
  0x37   :  { %784 = vmatprep.subr.mxu1 %v3305_v38 }
  0x38   :  { %785 = vmatpush1.msra.mxu1 %v3314_v40 }
  0x39   :  { %786 = vmatprep.subr.mxu1 %v3323_v42 }
  0x3a   :  { %787 = vmatpush1.msra.mxu1 %v3332_v44 }
  0x3b   :  { %788 = vmatprep.subr.mxu1 %v3341_v46 }
  0x3c   :  { %789 = vmatpush1.msra.mxu1 %v3350_v48 }
  0x3d   :  { %790 = vmatprep.subr.mxu1 %v3359_v50 }
  0x3e   :  { %791 = vmatpush1.msra.mxu1 %v3368_v52 }
  0x3f   :  { %792 = vmatprep.subr.mxu1 %v3377_v54 }
  0x40   :  { %793 = vmatpush1.msra.mxu1 %v3386_v56 }
  0x41   :  { %794 = vmatprep.subr.mxu1 %v3395_v58 }
  0x42   :  { %795 = vmatpush1.msra.mxu1 %v3406_v60 }
  0x43   :  { %796 = vmatprep.subr.mxu1 %v3415_v62 }
  0x44   :  { %797 = vmatpush1.msra.mxu1 %v3424_v0 }
  0x45   :  { %798 = vmatprep.subr.mxu1 %v3433_v2 }
  0x46   :  { %799 = vmatpush1.msra.mxu1 %v3442_v4 }
  0x47   :  { %800 = vmatprep.subr.mxu1 %v3451_v6 }
  0x48   :  { %801 = vmatpush1.msra.mxu1 %v3460_v8 }
  0x49   :  { %802 = vmatprep.subr.mxu1 %v3467_v12 }
  0x4a   :  { %803 = vmatpush1.msra.mxu1 %v3474_v13 }
  0x4b   :  { %990 = vmatprep.subr.mxu1 %v3177_v9  ;;  %v236_v9 = vld [vmem:[%s4661_s3 + $0x160] sm:$0xff] }
  0xc6   :  { %v2633_v14 = vpop.f32.mrf.mxu1 }
  0xc7   :  { %v3521_v22 = vadd.f32 %v2633_v14, %v3515_v16  ;;  %v206_v14 = vld [vmem:[%s4661_s3 + $0x70] sm:$0xff] }
  0xc8   :  { %v145_v18 = vpop.f32.mrf.mxu1 }
  0xc9   :  { %v3518_v20 = vadd.f32 %v3515_v16, %v145_v18  ;;  %v185_v29 = vmax.f32 %v3521_v22, 0.0  ;;  %v203_v18 = vld [vmem:[%s4661_s3 + $0x58] sm:$0xff]  ;;  %v3627_v22 = vld [vmem:[%s4662_s5 + $0x130] sm:$0xff] }
  0xca   :  { %v2636_v21 = vpop.f32.mrf.mxu1 }
  0xcb   :  { %v184_v24 = vmax.f32 %v3518_v20, 0.0  ;;  %v3547_v39 = vadd.f32 %v2636_v21, %v3515_v16  ;;  %v3620_v20 = vld [vmem:[%s4662_s5 + $0x148] sm:$0xff] }
  0xcc   :  { %v155_v26 = vpop.f32.mrf.mxu1 }
  0xcd   :  { %322 = vmatmul.mubr.f32.vlgmr.msra.gmra.mxu0 %v184_v24  ;;  %v3535_v31 = vadd.f32 %v3515_v16, %v155_v26  ;;  %v187_v49 = vmax.f32 %v3547_v39, 0.0  ;;  %v3655_v39 = vld [vmem:[%s4662_s5 + $0xd0] sm:$0xff] }
  0xce   :  { %2644 = vmatpush3.msra.mxu0 %v239_v7  ;;  %327 = vmatprep.mubr.f32.mxu0 %v4669_v10  ;;  %v2639_v35 = vpop.f32.mrf.mxu1 }
  0xcf   :  { %2645 = vmatprep.subr.mxu0 %v236_v9  ;;  %v186_v41 = vmax.f32 %v3535_v31, 0.0  ;;  %v171_v59 = vadd.f32 %v2639_v35, %v3515_v16  ;;  %v3603_v35 = vld [vmem:[%s4662_s5 + $0x178] sm:$0xff]  ;;  %v3648_v31 = vld [vmem:[%s4662_s5 + $0xe8] sm:$0xff] }
  0xd0   :  { %2646 = vmatpush3.msra.mxu0 %v236_v9  ;;  %v165_v43 = vpop.f32.mrf.mxu1  ;;  %v200_v9 = vld [vmem:[%s4661_s3 + $0x40] sm:$0xff] }
  0xd1   :  { %2647 = vmatprep.subr.mxu0 %v233_v28  ;;  %328 = vmatmul.mubr.f32.gmra.mxu0 %v185_v29  ;;  %v3561_v51 = vadd.f32 %v3515_v16, %v165_v43  ;;  %v189_v5 = vmax.f32 %v171_v59, 0.0  ;;  %v3671_v43 = vld [vmem:[%s4662_s5 + $0xa0] sm:$0xff] }
  0xd2   :  { %2648 = vmatpush3.msra.mxu0 %v233_v28  ;;  %333 = vmatprep.mubr.f32.mxu0 %v4669_v10  ;;  %v2642_v55 = vpop.f32.mrf.mxu1  ;;  %v197_v28 = vld [vmem:[%s4661_s3 + $0x28] sm:$0xff] }
  0xd3   :  { %2649 = vmatprep.subr.mxu0 %v230_v33  ;;  %v188_v61 = vmax.f32 %v3561_v51, 0.0  ;;  %v181_v21 = vadd.f32 %v2642_v55, %v3515_v16  ;;  %v3699_v51 = vld [vmem:[%s4662_s5 + $0x40] sm:$0xff]  ;;  %v3713_v55 = vld [vmem:[%s4662_s5 + $0x10] sm:$0xff] }
  0xd4   :  { %2650 = vmatpush3.msra.mxu0 %v230_v33  ;;  %v175_v63 = vpop.f32.mrf.mxu1  ;;  %4696 = vst [vmem:[#allocation9_spill] sm:$0xff] %v3713_v55 }
  0xd5   :  { %2651 = vmatprep.subr.mxu0 %v227_v37  ;;  %334 = vmatmul.mubr.f32.gmra.mxu0 %v186_v41  ;;  %v176_v7 = vadd.f32 %v3515_v16, %v175_v63  ;;  %v191_v33 = vmax.f32 %v181_v21, 0.0  ;;  %v194_v16 = vld [vmem:[%s4661_s3 + $0x10] sm:$0xff]  ;;  %v240_v63 = vld [vmem:[%s4664_s4] sm:$0x7] }
  0xd6   :  { %2652 = vmatpush3.msra.mxu0 %v227_v37  ;;  %339 = vmatprep.mubr.f32.mxu0 %v4669_v10  ;;  %v3611_v37 = vld [vmem:[%s4662_s5 + $0x160] sm:$0xff] }
  0xd7   :  { %2653 = vmatprep.subr.mxu0 %v224_v45  ;;  %v190_v26 = vmax.f32 %v176_v7, 0.0 }
  0xd8   :  { %2654 = vmatpush3.msra.mxu0 %v224_v45  ;;  %v3678_v45 = vld [vmem:[%s4662_s5 + $0x88] sm:$0xff] }
  0xd9   :  { %2655 = vmatprep.subr.mxu0 %v221_v47  ;;  %340 = vmatmul.mubr.f32.gmra.mxu0 %v187_v49 }
  0xda   :  { %2656 = vmatpush3.msra.mxu0 %v221_v47  ;;  %345 = vmatprep.mubr.f32.mxu0 %v4669_v10  ;;  %v3685_v47 = vld [vmem:[%s4662_s5 + $0x70] sm:$0xff] }
  0xdb   :  { %2657 = vmatprep.subr.mxu0 %v218_v53 }
  0xdc   :  { %2658 = vmatpush3.msra.mxu0 %v218_v53  ;;  %v3706_v53 = vld [vmem:[%s4662_s5 + $0x28] sm:$0xff] }
  0xdd   :  { %2659 = vmatprep.subr.mxu0 %v215_v57  ;;  %346 = vmatmul.mubr.f32.gmra.mxu0 %v188_v61  ;;  %4695 = vst [vmem:[#allocation8_spill] sm:$0xff] %v3706_v53 }
  0xde   :  { %2660 = vmatpush3.msra.mxu0 %v215_v57  ;;  %351 = vmatprep.mubr.f32.mxu0 %v4669_v10  ;;  %v242_v57 = vlaneseq }
  0xdf   :  { %2661 = vmatprep.subr.mxu0 %v212_v1 }
  0xe0   :  { %2662 = vmatpush3.msra.mxu0 %v212_v1  ;;  %v243_v59 = vshrl.u32 %v242_v57, 7 }
  0xe1   :  { %2663 = vmatprep.subr.mxu0 %v209_v3  ;;  %352 = vmatmul.mubr.f32.gmra.mxu0 %v189_v5 }
  0xe2   :  { %2664 = vmatpush3.msra.mxu0 %v209_v3  ;;  %357 = vmatprep.mubr.f32.mxu0 %v4669_v10  ;;  %v248_v3 = vsub.s32 1, %v243_v59 }
  0xe3   :  { %2665 = vmatprep.subr.mxu0 %v206_v14 }
  0xe4   :  { %2666 = vmatpush3.msra.mxu0 %v206_v14 }
  0xe5   :  { %2667 = vmatprep.subr.mxu0 %v203_v18  ;;  %358 = vmatmul.mubr.f32.gmra.mxu0 %v190_v26 }
  0xe6   :  { %2668 = vmatpush3.msra.mxu0 %v203_v18  ;;  %363 = vmatprep.mubr.f32.mxu0 %v4669_v10  ;;  %v249_v18 = vrot.slane %v240_v63, %v248_v3 }
  0xe7   :  { %2669 = vmatprep.subr.mxu0 %v200_v9 }
  0xe8   :  { %2670 = vmatpush3.msra.mxu0 %v200_v9 }
  0xe9   :  { %2671 = vmatprep.subr.mxu0 %v197_v28  ;;  %364 = vmatmul.mubr.f32.gmra.mxu0 %v191_v33 }
  0xea   :  { %2672 = vmatpush3.msra.mxu0 %v197_v28  ;;  %2675 = vmatprep.mubr.f32.mxu0 %v184_v24  ;;  %v3634_v24 = vld [vmem:[%s4662_s5 + $0x118] sm:$0xff] }
  0xeb   :  { %2673 = vmatprep.subr.mxu0 %v194_v16 }
  0xec   :  { %2674 = vmatpush3.msra.mxu0 %v194_v16 }
  0xed   :  { %2687 = vmatprep.subr.mxu0 %v4669_v10  ;;  %2676 = vmatmul.mubr.f32.vlgmr.msra.gmra.mxu0 %v185_v29  ;;  %v3641_v29 = vld [vmem:[%s4662_s5 + $0x100] sm:$0xff] }
  0xee   :  { %2688 = vmatpush3.msra.mxu0 %v3603_v35  ;;  %2678 = vmatprep.mubr.f32.mxu0 %v186_v41  ;;  %v3664_v41 = vld [vmem:[%s4662_s5 + $0xb8] sm:$0xff] }
  0xef   :  { %2689 = vmatprep.subr.mxu0 %v4669_v10 }
  0xf0   :  { %2690 = vmatpush3.msra.mxu0 %v3611_v37 }
  0xf1   :  { %2691 = vmatprep.subr.mxu0 %v4669_v10  ;;  %2679 = vmatmul.mubr.f32.gmra.mxu0 %v187_v49  ;;  %v3692_v49 = vld [vmem:[%s4662_s5 + $0x58] sm:$0xff] }
  0xf2   :  { %2692 = vmatpush3.msra.mxu0 %v3620_v20  ;;  %2681 = vmatprep.mubr.f32.mxu0 %v188_v61  ;;  %v244_v61 = vsub.s32 0, %v243_v59 }
  0xf3   :  { %2693 = vmatprep.subr.mxu0 %v4669_v10 }
  0xf4   :  { %2694 = vmatpush3.msra.mxu0 %v3627_v22  ;;  %v245_v7 = vrot.slane %v240_v63, %v244_v61 }
  0xf5   :  { %2695 = vmatprep.subr.mxu0 %v4669_v10  ;;  %2682 = vmatmul.mubr.f32.gmra.mxu0 %v189_v5 }
  0xf6   :  { %2696 = vmatpush3.msra.mxu0 %v3634_v24  ;;  %2684 = vmatprep.mubr.f32.mxu0 %v190_v26 }
  0xf7   :  { %2697 = vmatprep.subr.mxu0 %v4669_v10 }
  0xf8   :  { %2698 = vmatpush3.msra.mxu0 %v3641_v29 }
  0xf9   :  { %2699 = vmatprep.subr.mxu0 %v4669_v10  ;;  %2685 = vmatmul.mubr.f32.gmra.mxu0 %v191_v33 }
  0xfa   :  { %2700 = vmatpush3.msra.mxu0 %v3648_v31  ;;  %2719 = vmatprep.mubr.msk.f32.mxu0 %vm3095_vm1, %v4669_v10 }
  0xfb   :  { %2701 = vmatprep.subr.mxu0 %v4669_v10 }
  0xfc   :  { %2702 = vmatpush3.msra.mxu0 %v3655_v39 }
  0xfd   :  { %2703 = vmatprep.subr.mxu0 %v4669_v10 }
  0xfe   :  { %2704 = vmatpush3.msra.mxu0 %v3664_v41 }
  0xff   :  { %2705 = vmatprep.subr.mxu0 %v4669_v10 }
 0x100   :  { %2706 = vmatpush3.msra.mxu0 %v3671_v43 }
 0x101   :  { %2707 = vmatprep.subr.mxu0 %v4669_v10 }
 0x102   :  { %2708 = vmatpush3.msra.mxu0 %v3678_v45 }
 0x103   :  { %2709 = vmatprep.subr.mxu0 %v4669_v10 }
 0x104   :  { %2710 = vmatpush3.msra.mxu0 %v3685_v47 }
 0x105   :  { %2711 = vmatprep.subr.mxu0 %v4669_v10 }
 0x106   :  { %2712 = vmatpush3.msra.mxu0 %v3692_v49 }
 0x107   :  { %2713 = vmatprep.subr.mxu0 %v4669_v10 }
 0x108   :  { %2714 = vmatpush3.msra.mxu0 %v3699_v51 }
 0x109   :  { %2715 = vmatprep.subr.mxu0 %v4669_v10 }
 0x10a   :  { %2716 = vmatpush3.msra.mxu0 %v3706_v53 }
 0x10b   :  { %2717 = vmatprep.subr.mxu0 %v4669_v10 }
 0x10c   :  { %2718 = vmatpush3.msra.mxu0 %v3713_v55 }
 0x10d   :  { %2720 = vmatmul.mubr.f32.vlgmr.msra.gmra.mxu0 %v4669_v10  ;;  %2722 = vmatprep.subr.mxu0 %v4669_v10 }
 0x10e   :  { %2723 = vmatpush3.msra.mxu0 %v3603_v35  ;;  %2754 = vmatprep.mubr.msk.f32.mxu0 %vm3095_vm1, %v4669_v10 }
 0x10f   :  { %2724 = vmatprep.subr.mxu0 %v4669_v10 }
 0x110   :  { %2725 = vmatpush3.msra.mxu0 %v3611_v37 }
 0x111   :  { %2726 = vmatprep.subr.mxu0 %v4669_v10 }
 0x112   :  { %2727 = vmatpush3.msra.mxu0 %v3620_v20 }
 0x113   :  { %2728 = vmatprep.subr.mxu0 %v4669_v10 }
 0x114   :  { %2729 = vmatpush3.msra.mxu0 %v3627_v22 }
 0x115   :  { %2730 = vmatprep.subr.mxu0 %v4669_v10 }
 0x116   :  { %2731 = vmatpush3.msra.mxu0 %v3634_v24 }
 0x117   :  { %2732 = vmatprep.subr.mxu0 %v4669_v10 }
 0x118   :  { %2733 = vmatpush3.msra.mxu0 %v3641_v29 }
 0x119   :  { %2734 = vmatprep.subr.mxu0 %v4669_v10 }
 0x11a   :  { %2735 = vmatpush3.msra.mxu0 %v3648_v31 }
 0x11b   :  { %2736 = vmatprep.subr.mxu0 %v4669_v10 }
 0x11c   :  { %2737 = vmatpush3.msra.mxu0 %v3655_v39 }
 0x11d   :  { %2738 = vmatprep.subr.mxu0 %v4669_v10 }
 0x11e   :  { %2739 = vmatpush3.msra.mxu0 %v3664_v41 }
 0x11f   :  { %2740 = vmatprep.subr.mxu0 %v4669_v10 }
 0x120   :  { %2741 = vmatpush3.msra.mxu0 %v3671_v43 }
 0x121   :  { %2742 = vmatprep.subr.mxu0 %v4669_v10 }
 0x122   :  { %2743 = vmatpush3.msra.mxu0 %v3678_v45 }
 0x123   :  { %2744 = vmatprep.subr.mxu0 %v4669_v10 }
 0x124   :  { %2745 = vmatpush3.msra.mxu0 %v3685_v47 }
 0x125   :  { %2746 = vmatprep.subr.mxu0 %v4669_v10 }
 0x126   :  { %2747 = vmatpush3.msra.mxu0 %v3692_v49 }
 0x127   :  { %2748 = vmatprep.subr.mxu0 %v4669_v10 }
 0x128   :  { %2749 = vmatpush3.msra.mxu0 %v3699_v51 }
 0x129   :  { %2750 = vmatprep.subr.mxu0 %v4669_v10 }
 0x12a   :  { %2751 = vmatpush3.msra.mxu0 %v3706_v53 }
 0x12b   :  { %2752 = vmatprep.subr.mxu0 %v4669_v10 }
 0x12c   :  { %2753 = vmatpush3.msra.mxu0 %v3713_v55 }
 0x12d   :  { %2757 = vmatprep.subr.mxu0 %v4669_v10 }
 0x18d   :  { %v323_v1 = vpop.f32.mrf.mxu0 }
 0x18f   :  { %v325_v5 = vpop.f32.mrf.mxu0 }
 0x191   :  { %v329_v14 = vpop.f32.mrf.mxu0 }
 0x192   :  { %v3757_v21 = vadd.f32 %v329_v14, %v245_v7 }
 0x193   :  { %v331_v26 = vpop.f32.mrf.mxu0 }
 0x194   :  { %4697 = vst [vmem:[#allocation10_spill] sm:$0xff] %v3757_v21  ;;  %v3759_v9 = vadd.f32 %v331_v26, %v249_v18 }
 0x195   :  { %v335_v28 = vpop.f32.mrf.mxu0 }
 0x196   :  { %4698 = vst [vmem:[#allocation11_spill] sm:$0xff] %v3759_v9  ;;  %v3761_v33 = vadd.f32 %v335_v28, %v245_v7  ;;  %v324_v9 = vadd.f32 %v323_v1, %v245_v7  ;;  %v621_v28 = vpop.f32.mrf.mxu1 }
 0x197   :  { %v337_v16 = vpop.f32.mrf.mxu0 }
 0x198   :  { %4699 = vst [vmem:[#allocation12_spill] sm:$0xff] %v3761_v33  ;;  %v3763_v57 = vadd.f32 %v337_v16, %v249_v18 }
 0x199   :  { %v341_v10 = vpop.f32.mrf.mxu0 }
 0x19a   :  { %4700 = vst [vmem:[#allocation13_spill] sm:$0xff] %v3763_v57  ;;  %v3765_v55 = vadd.f32 %v341_v10, %v245_v7  ;;  %v702_v10 = vadd.f32 %v621_v28, %v324_v9 }
 0x19b   :  { %v343_v13 = vpop.f32.mrf.mxu0 }
 0x19c   :  { %4701 = vst [vmem:[#allocation14_spill] sm:$0xff] %v3765_v55  ;;  %v3767_v12 = vadd.f32 %v343_v13, %v249_v18  ;;  %v252_v13 = vsub.s32 2, %v243_v59 }
 0x19d   :  { %v347_v61 = vpop.f32.mrf.mxu0 }
 0x19e   :  { %4702 = vst [vmem:[#allocation15_spill] sm:$0xff] %v3767_v12  ;;  %v3769_v53 = vadd.f32 %v347_v61, %v245_v7 }
 0x19f   :  { %v349_v3 = vpop.f32.mrf.mxu0 }
 0x1a0   :  { %4703 = vst [vmem:[#allocation16_spill] sm:$0xff] %v3769_v53  ;;  %v3771_v14 = vadd.f32 %v349_v3, %v249_v18  ;;  %v2416_v53 = vmul.f32 -1.442695, %v702_v10  ;;  %v623_v10 = vpop.f32.mrf.mxu1 }
 0x1a1   :  { %v353_v26 = vpop.f32.mrf.mxu0 }
 0x1a2   :  { %4704 = vst [vmem:[#allocation17_spill] sm:$0xff] %v3771_v14  ;;  %v3773_v21 = vadd.f32 %v353_v26, %v245_v7  ;;  %v253_v14 = vrot.slane %v240_v63, %v252_v13  ;;  %3013 = vpow2.f32 %v2416_v53 }
 0x1a3   :  { %v355_v33 = vpop.f32.mrf.mxu0 }
 0x1a4   :  { %4705 = vst [vmem:[#allocation18_spill] sm:$0xff] %v3773_v21  ;;  %v3775_v16 = vadd.f32 %v355_v33, %v249_v18 }
 0x1a5   :  { %v359_v57 = vpop.f32.mrf.mxu0 }
 0x1a6   :  { %4706 = vst [vmem:[#allocation19_spill] sm:$0xff] %v3775_v16  ;;  %v3777_v55 = vadd.f32 %v359_v57, %v245_v7 }
 0x1a7   :  { %v361_v12 = vpop.f32.mrf.mxu0 }
 0x1a8   :  { %4707 = vst [vmem:[#allocation20_spill] sm:$0xff] %v3777_v55  ;;  %v3779_v8 = vadd.f32 %v361_v12, %v249_v18  ;;  %v326_v12 = vadd.f32 %v325_v5, %v249_v18 }
 0x1a9   :  { %v365_v61 = vpop.f32.mrf.mxu0 }
 0x1aa   :  { %4708 = vst [vmem:[#allocation21_spill] sm:$0xff] %v3779_v8  ;;  %v3781_v3 = vadd.f32 %v365_v61, %v245_v7  ;;  %v709_v61 = vadd.f32 %v623_v10, %v326_v12 }
 0x1ab   :  { %v367_v1 = vpop.f32.mrf.mxu0 }
 0x1ac   :  { %4709 = vst [vmem:[#allocation22_spill] sm:$0xff] %v3781_v3  ;;  %v3783_v26 = vadd.f32 %v367_v1, %v249_v18 }
 0x1ad   :  { %v2677_v21 = vpop.f32.mrf.mxu0 }
 0x1ae   :  { %4710 = vst [vmem:[#allocation23_spill] sm:$0xff] %v3783_v26  ;;  %v3785_v33 = vadd.f32 %v2677_v21, %v253_v14 }
 0x1af   :  { %v436_v16 = vpop.f32.mrf.mxu0  ;;  %v3014_v21 = vpop.eup %3013 }
 0x1b0   :  { %v706_v55 = vadd.f32 1.0, %v3014_v21 }
 0x1b1   :  { %v2680_v9 = vpop.f32.mrf.mxu0 }
 0x1b2   :  { %v3787_v57 = vadd.f32 %v2680_v9, %v253_v14  ;;  %v2417_v9 = vmul.f32 -1.442695, %v709_v61 }
 0x1b3   :  { %v446_v59 = vpop.f32.mrf.mxu0 }
 0x1b4   :  { %v3789_v28 = vadd.f32 %v446_v59, %v253_v14  ;;  %3015 = vpow2.f32 %v2417_v9 }
 0x1b5   :  { %v2683_v8 = vpop.f32.mrf.mxu0  ;;  %3017 = vrcp.f32 %v706_v55 }
 0x1b6   :  { %v3791_v7 = vadd.f32 %v2683_v8, %v253_v14  ;;  %v3802_v8 = vld [vmem:[%s4665_s6] ss:$0 sm:$0xff] }
 0x1b7   :  { %v456_v63 = vpop.f32.mrf.mxu0 }
 0x1b8   :  { %4711 = vst [vmem:[#allocation24_spill] sm:$0xff] %v3791_v7  ;;  %v3793_v13 = vadd.f32 %v456_v63, %v253_v14  ;;  %v437_v63 = vadd.f32 %v436_v16, %v253_v14  ;;  %v4005_v16 = vld [vmem:[%s4662_s5 + $0xc8] sm:$0xff] }
 0x1b9   :  { %v2686_v1 = vpop.f32.mrf.mxu0 }
 0x1ba   :  { %4712 = vst [vmem:[#allocation25_spill] sm:$0xff] %v3793_v13  ;;  %v3795_v53 = vadd.f32 %v2686_v1, %v253_v14 }
 0x1bb   :  { %v466_v26 = vpop.f32.mrf.mxu0 }
 0x1bc   :  { %4713 = vst [vmem:[#allocation26_spill] sm:$0xff] %v3795_v53  ;;  %v3797_v3 = vadd.f32 %v466_v26, %v253_v14  ;;  %v4716_v14 = vmov 0.0  }
 0x1be   :  { %4714 = vst [vmem:[#allocation27_spill] sm:$0xff] %v3797_v3 }
 0x1c1   :  { %v3016_v18 = vpop.eup %3015 }
 0x1c2   :  { %v3018_v12 = vpop.eup %3017  ;;  %v713_v53 = vadd.f32 1.0, %v3016_v18  ;;  %v4028_v18 = vld [vmem:[%s4662_s5 + $0x98] sm:$0xff] }
 0x1cd   :  { %v692_v5 = vpop.f32.mrf.mxu0 }
 0x1ce   :  { %v716_v59 = vadd.f32 %v3802_v8, %v692_v5  ;;  %v4022_v5 = vld [vmem:[%s4662_s5 + $0xa8] sm:$0xff] }
 0x1cf   :  { %v2721_v10 = vpop.f32.mrf.mxu0 }
 0x1d0   :  { %v717_v1 = vmul.f32 %v3018_v12, %v716_v59  ;;  %v4034_v59 = vld [vmem:[%s4662_s5 + $0x90] sm:$0xff]  ;;  %v4040_v12 = vld [vmem:[%s4662_s5 + $0x80] sm:$0xff]  ;;  %v4046_v10 = vld [vmem:[%s4662_s5 + $0x78] sm:$0xff] }
 0x1d2   :  { %v718_v26 = vadd.f32 %v717_v1, %v437_v63  ;;  %v4052_v63 = vld [vmem:[%s4662_s5 + $0x68] sm:$0xff]  ;;  %v4058_v1 = vld [vmem:[%s4662_s5 + $0x60] sm:$0xff] }
 0x1d4   :  { %3019 = vtanh.f32 %v718_v26  ;;  %v4064_v26 = vld [vmem:[%s4662_s5 + $0x50] sm:$0xff] }
 0x1d5   :  { %3021 = vrcp.f32 %v713_v53  ;;  %v4016_v53 = vld [vmem:[%s4662_s5 + $0xb0] sm:$0xff] }
 0x1e1   :  { %v3020_v61 = vpop.eup %3019 }
 0x1e2   :  { %v720_v21 = vsub.f32 0.0, %v3020_v61  ;;  %v3022_v55 = vpop.eup %3021 }
 0x1e4   :  { %v721_v9 = vmul.f32 %v3022_v55, %v720_v21  ;;  %v4076_v21 = vld [vmem:[%s4662_s5 + $0x38] sm:$0xff]  ;;  %v4082_v55 = vld [vmem:[%s4662_s5 + $0x30] sm:$0xff] }
 0x1e6   :  { %v3805_v3 = vadd.f32 %v3020_v61, %v721_v9  ;;  %v4070_v61 = vld [vmem:[%s4662_s5 + $0x48] sm:$0xff]  ;;  %v4088_v9 = vld [vmem:[%s4662_s5 + $0x20] sm:$0xff] }
 0x1e8   :  { %4715 = vst [vmem:[#allocation28_spill] sm:$0xff] %v3805_v3  ;;  %837 = vmatmul.mubr.f32.vlgmr.msra.gmra.mxu1 %v3805_v3  ;;  %2755 = vmatmul.mubr.f32.vlgmr.msra.gmra.mxu0 %v3805_v3 }
 0x1e9   :  { %991 = vmatpush1.msra.mxu1 %v3186_v11  ;;  %2758 = vmatpush3.msra.mxu0 %v3603_v35  ;;  %v4717_v11 = vld [vmem:[#allocation5_spill] sm:$0xff] }
 0x1ea   :  { %992 = vmatprep.subr.mxu1 %v3202_v15  ;;  %2759 = vmatprep.subr.mxu0 %v4716_v14  ;;  %v4718_v15 = vld [vmem:[#allocation8_spill] sm:$0xff] }
 0x1eb   :  { %993 = vmatpush1.msra.mxu1 %v3211_v17  ;;  %2760 = vmatpush3.msra.mxu0 %v3611_v37  ;;  %v4719_v17 = vld [vmem:[#allocation6_spill] sm:$0xff] }
 0x1ec   :  { %994 = vmatprep.subr.mxu1 %v3220_v19  ;;  %2761 = vmatprep.subr.mxu0 %v4716_v14  ;;  %v4720_v19 = vld [vmem:[#allocation7_spill] sm:$0xff] }
 0x1ed   :  { %995 = vmatpush1.msra.mxu1 %v3237_v23  ;;  %2762 = vmatpush3.msra.mxu0 %v3620_v20  ;;  %v4721_v23 = vld [vmem:[#allocation9_spill] sm:$0xff] }
 0x1ee   :  { %996 = vmatprep.subr.mxu1 %v3246_v25  ;;  %2763 = vmatprep.subr.mxu0 %v4716_v14 }
 0x1ef   :  { %997 = vmatpush1.msra.mxu1 %v3255_v27  ;;  %2764 = vmatpush3.msra.mxu0 %v3627_v22 }
 0x1f0   :  { %998 = vmatprep.subr.mxu1 %v3269_v30  ;;  %2765 = vmatprep.subr.mxu0 %v4716_v14  ;;  %v4722_v30 = vld [vmem:[#allocation10_spill] sm:$0xff] }
 0x1f1   :  { %999 = vmatpush1.msra.mxu1 %v3278_v32  ;;  %2766 = vmatpush3.msra.mxu0 %v3634_v24 }
 0x1f2   :  { %1000 = vmatprep.subr.mxu1 %v3287_v34  ;;  %2767 = vmatprep.subr.mxu0 %v4716_v14 }
 0x1f3   :  { %1001 = vmatpush1.msra.mxu1 %v3296_v36  ;;  %2768 = vmatpush3.msra.mxu0 %v3641_v29 }
 0x1f4   :  { %1002 = vmatprep.subr.mxu1 %v3305_v38  ;;  %2769 = vmatprep.subr.mxu0 %v4716_v14 }
 0x1f5   :  { %1003 = vmatpush1.msra.mxu1 %v3314_v40  ;;  %2770 = vmatpush3.msra.mxu0 %v3648_v31  ;;  %v4723_v40 = vld [vmem:[#allocation11_spill] sm:$0xff] }
 0x1f6   :  { %1004 = vmatprep.subr.mxu1 %v3323_v42  ;;  %2771 = vmatprep.subr.mxu0 %v4716_v14 }
 0x1f7   :  { %1005 = vmatpush1.msra.mxu1 %v3332_v44  ;;  %2772 = vmatpush3.msra.mxu0 %v3655_v39 }
 0x1f8   :  { %1006 = vmatprep.subr.mxu1 %v3341_v46  ;;  %2773 = vmatprep.subr.mxu0 %v4716_v14 }
 0x1f9   :  { %1007 = vmatpush1.msra.mxu1 %v3350_v48  ;;  %2774 = vmatpush3.msra.mxu0 %v3664_v41 }
 0x1fa   :  { %1008 = vmatprep.subr.mxu1 %v3359_v50  ;;  %2775 = vmatprep.subr.mxu0 %v4716_v14 }
 0x1fb   :  { %1009 = vmatpush1.msra.mxu1 %v3368_v52  ;;  %2776 = vmatpush3.msra.mxu0 %v3671_v43 }
 0x1fc   :  { %1010 = vmatprep.subr.mxu1 %v3377_v54  ;;  %2777 = vmatprep.subr.mxu0 %v4716_v14 }
 0x1fd   :  { %1011 = vmatpush1.msra.mxu1 %v3386_v56  ;;  %2778 = vmatpush3.msra.mxu0 %v3678_v45 }
 0x1fe   :  { %1012 = vmatprep.subr.mxu1 %v3395_v58  ;;  %2779 = vmatprep.subr.mxu0 %v4716_v14 }
 0x1ff   :  { %1013 = vmatpush1.msra.mxu1 %v3406_v60  ;;  %2780 = vmatpush3.msra.mxu0 %v3685_v47 }
 0x200   :  { %1014 = vmatprep.subr.mxu1 %v3415_v62  ;;  %2781 = vmatprep.subr.mxu0 %v4716_v14 }
 0x201   :  { %1015 = vmatpush1.msra.mxu1 %v3424_v0  ;;  %2782 = vmatpush3.msra.mxu0 %v3692_v49 }
 0x202   :  { %1016 = vmatprep.subr.mxu1 %v3433_v2  ;;  %2783 = vmatprep.subr.mxu0 %v4716_v14 }
 0x203   :  { %1017 = vmatpush1.msra.mxu1 %v3442_v4  ;;  %2784 = vmatpush3.msra.mxu0 %v3699_v51 }
 0x204   :  { %1018 = vmatprep.subr.mxu1 %v3451_v6  ;;  %2785 = vmatprep.subr.mxu0 %v4716_v14 }
 0x205   :  { %1019 = vmatpush1.msra.mxu1 %v4717_v11  ;;  %2786 = vmatpush3.msra.mxu0 %v4718_v15  ;;  %v4094_v11 = vld [vmem:[%s4662_s5 + $0x18] sm:$0xff] }
 0x206   :  { %1020 = vmatprep.subr.mxu1 %v4719_v17  ;;  %2787 = vmatprep.subr.mxu0 %v4716_v14  ;;  %4726 = vst [vmem:[#allocation6_spill] sm:$0xff] %v4094_v11  ;;  %v4106_v17 = vld [vmem:[%s4662_s5] sm:$0xff] }
 0x207   :  { %1021 = vmatpush1.msra.mxu1 %v4720_v19  ;;  %1054 = vmatprep.mubr.f32.mxu1 %v4716_v14  ;;  %4728 = vst [vmem:[#allocation9_spill] sm:$0xff] %v4106_v17 }
 0x208   :  { %2788 = vmatpush3.msra.mxu0 %v4721_v23  ;;  %2789 = vmatprep.mubr.msk.f32.mxu0 %vm3095_vm1, %v4716_v14 }
 0x209   :  { %2792 = vmatprep.subr.mxu0 %v4716_v14 }
 0x2a8   :  { %v838_v25 = vpop.f32.mrf.mxu1  ;;  %v909_v27 = vpop.f32.mrf.mxu0 }
 0x2a9   :  { %v919_v32 = vadd.f32 %v838_v25, %v4722_v30  ;;  %v933_v52 = vadd.f32 %v3802_v8, %v909_v27  ;;  %v4729_v25 = vld [vmem:[#allocation12_spill] sm:$0xff] }
 0x2aa   :  { %v2756_v34 = vpop.f32.mrf.mxu0  ;;  %v840_v38 = vpop.f32.mrf.mxu1 }
 0x2ab   :  { %v2418_v36 = vmul.f32 -1.442695, %v919_v32  ;;  %v926_v42 = vadd.f32 %v840_v38, %v4723_v40 }
 0x2ad   :  { %3023 = vpow2.f32 %v2418_v36  ;;  %v2419_v44 = vmul.f32 -1.442695, %v926_v42  ;;  %v4730_v36 = vld [vmem:[#allocation13_spill] sm:$0xff] }
 0x2af   :  { %3025 = vpow2.f32 %v2419_v44 }
 0x2ba   :  { %v3024_v46 = vpop.eup %3023 }
 0x2bb   :  { %v923_v48 = vadd.f32 1.0, %v3024_v46 }
 0x2bc   :  { %v3026_v50 = vpop.eup %3025 }
 0x2bd   :  { %3027 = vrcp.f32 %v923_v48  ;;  %v930_v60 = vadd.f32 1.0, %v3026_v50 }
 0x2ca   :  { %v3028_v54 = vpop.eup %3027 }
 0x2cb   :  { %v934_v56 = vmul.f32 %v3028_v54, %v933_v52 }
 0x2cd   :  { %v935_v58 = vadd.f32 %v934_v56, %v3785_v33  ;;  %v4010_v33 = vld [vmem:[%s4662_s5 + $0xc0] sm:$0xff] }
 0x2cf   :  { %3029 = vtanh.f32 %v935_v58 }
 0x2d0   :  { %3031 = vrcp.f32 %v930_v60 }
 0x2dc   :  { %v3030_v62 = vpop.eup %3029 }
 0x2dd   :  { %v937_v0 = vsub.f32 %v3805_v3, %v3030_v62  ;;  %v3032_v2 = vpop.eup %3031 }
 0x2df   :  { %v938_v4 = vmul.f32 %v3032_v2, %v937_v0 }
 0x2e1   :  { %v3880_v6 = vadd.f32 %v3030_v62, %v938_v4  ;;  %v4166_v4 = vld [vmem:[%s4662_s5 + $0x160] sm:$0xff] }
 0x2e3   :  { %4724 = vst [vmem:[#allocation5_spill] sm:$0xff] %v3880_v6  ;;  %1055 = vmatmul.mubr.f32.vlgmr.msra.gmra.mxu1 %v3880_v6  ;;  %2790 = vmatmul.mubr.f32.vlgmr.msra.gmra.mxu0 %v3880_v6 }
 0x2e4   :  { %2793 = vmatpush3.msra.mxu0 %v3603_v35  ;;  %1272 = vmatprep.mubr.f32.mxu1 %v4716_v14  ;;  %v3922_v35 = vld [vmem:[%s4662_s5 + $0x170] sm:$0xff] }
 0x2e5   :  { %2794 = vmatprep.subr.mxu0 %v4716_v14  ;;  %2824 = vmatprep.mubr.msk.f32.mxu0 %vm3095_vm1, %v4716_v14  ;;  %4725 = vst [vmem:[#allocation8_spill] sm:$0xff] %v3922_v35 }
 0x2e6   :  { %2795 = vmatpush3.msra.mxu0 %v3611_v37  ;;  %1208 = vmatprep.subr.mxu1 %v3922_v35  ;;  %v3928_v37 = vld [vmem:[%s4662_s5 + $0x168] sm:$0xff] }
 0x2e7   :  { %2796 = vmatprep.subr.mxu0 %v4716_v14  ;;  %1209 = vmatpush1.msra.mxu1 %v3928_v37 }
 0x2e8   :  { %2797 = vmatpush3.msra.mxu0 %v3620_v20  ;;  %v3934_v20 = vld [vmem:[%s4662_s5 + $0x158] sm:$0xff] }
 0x2e9   :  { %2798 = vmatprep.subr.mxu0 %v4716_v14  ;;  %1210 = vmatprep.subr.mxu1 %v3934_v20 }
 0x2ea   :  { %2799 = vmatpush3.msra.mxu0 %v3627_v22  ;;  %v3940_v22 = vld [vmem:[%s4662_s5 + $0x150] sm:$0xff] }
 0x2eb   :  { %2800 = vmatprep.subr.mxu0 %v4716_v14  ;;  %1211 = vmatpush1.msra.mxu1 %v3940_v22 }
 0x2ec   :  { %2801 = vmatpush3.msra.mxu0 %v3634_v24  ;;  %v3946_v24 = vld [vmem:[%s4662_s5 + $0x140] sm:$0xff] }
 0x2ed   :  { %2802 = vmatprep.subr.mxu0 %v4716_v14  ;;  %1212 = vmatprep.subr.mxu1 %v3946_v24 }
 0x2ee   :  { %2803 = vmatpush3.msra.mxu0 %v3641_v29  ;;  %v3952_v29 = vld [vmem:[%s4662_s5 + $0x138] sm:$0xff] }
 0x2ef   :  { %2804 = vmatprep.subr.mxu0 %v4716_v14  ;;  %1213 = vmatpush1.msra.mxu1 %v3952_v29 }
 0x2f0   :  { %2805 = vmatpush3.msra.mxu0 %v3648_v31  ;;  %v3958_v31 = vld [vmem:[%s4662_s5 + $0x128] sm:$0xff] }
 0x2f1   :  { %2806 = vmatprep.subr.mxu0 %v4716_v14  ;;  %1214 = vmatprep.subr.mxu1 %v3958_v31 }
 0x2f2   :  { %2807 = vmatpush3.msra.mxu0 %v3655_v39  ;;  %v3964_v39 = vld [vmem:[%s4662_s5 + $0x120] sm:$0xff] }
 0x2f3   :  { %2808 = vmatprep.subr.mxu0 %v4716_v14  ;;  %1215 = vmatpush1.msra.mxu1 %v3964_v39 }
 0x2f4   :  { %2809 = vmatpush3.msra.mxu0 %v3664_v41  ;;  %v3970_v41 = vld [vmem:[%s4662_s5 + $0x110] sm:$0xff] }
 0x2f5   :  { %2810 = vmatprep.subr.mxu0 %v4716_v14  ;;  %1216 = vmatprep.subr.mxu1 %v3970_v41 }
 0x2f6   :  { %2811 = vmatpush3.msra.mxu0 %v3671_v43  ;;  %v3976_v43 = vld [vmem:[%s4662_s5 + $0x108] sm:$0xff] }
 0x2f7   :  { %2812 = vmatprep.subr.mxu0 %v4716_v14  ;;  %1217 = vmatpush1.msra.mxu1 %v3976_v43 }
 0x2f8   :  { %2813 = vmatpush3.msra.mxu0 %v3678_v45  ;;  %v3982_v45 = vld [vmem:[%s4662_s5 + $0xf8] sm:$0xff] }
 0x2f9   :  { %2814 = vmatprep.subr.mxu0 %v4716_v14  ;;  %1218 = vmatprep.subr.mxu1 %v3982_v45 }
 0x2fa   :  { %2815 = vmatpush3.msra.mxu0 %v3685_v47  ;;  %v3988_v47 = vld [vmem:[%s4662_s5 + $0xf0] sm:$0xff] }
 0x2fb   :  { %2816 = vmatprep.subr.mxu0 %v4716_v14  ;;  %1219 = vmatpush1.msra.mxu1 %v3988_v47 }
 0x2fc   :  { %2817 = vmatpush3.msra.mxu0 %v3692_v49  ;;  %v3994_v49 = vld [vmem:[%s4662_s5 + $0xe0] sm:$0xff] }
 0x2fd   :  { %2818 = vmatprep.subr.mxu0 %v4716_v14  ;;  %1220 = vmatprep.subr.mxu1 %v3994_v49 }
 0x2fe   :  { %2819 = vmatpush3.msra.mxu0 %v3699_v51  ;;  %v4000_v51 = vld [vmem:[%s4662_s5 + $0xd8] sm:$0xff] }
 0x2ff   :  { %2820 = vmatprep.subr.mxu0 %v4716_v14  ;;  %1221 = vmatpush1.msra.mxu1 %v4000_v51 }
 0x300   :  { %2821 = vmatpush3.msra.mxu0 %v4718_v15  ;;  %1222 = vmatprep.subr.mxu1 %v4005_v16  ;;  %v4100_v15 = vld [vmem:[%s4662_s5 + $0x8] sm:$0xff] }
 0x301   :  { %2822 = vmatprep.subr.mxu0 %v4716_v14  ;;  %1223 = vmatpush1.msra.mxu1 %v4010_v33  ;;  %4727 = vst [vmem:[#allocation7_spill] sm:$0xff] %v4100_v15 }
 0x302   :  { %2823 = vmatpush3.msra.mxu0 %v4721_v23  ;;  %1224 = vmatprep.subr.mxu1 %v4016_v53 }
 0x303   :  { %2827 = vmatprep.subr.mxu0 %v4716_v14  ;;  %1225 = vmatpush1.msra.mxu1 %v4022_v5 }
 0x304   :  { %1226 = vmatprep.subr.mxu1 %v4028_v18 }
 0x305   :  { %1227 = vmatpush1.msra.mxu1 %v4034_v59 }
 0x306   :  { %1228 = vmatprep.subr.mxu1 %v4040_v12 }
 0x307   :  { %1229 = vmatpush1.msra.mxu1 %v4046_v10 }
 0x308   :  { %1230 = vmatprep.subr.mxu1 %v4052_v63 }
 0x309   :  { %1231 = vmatpush1.msra.mxu1 %v4058_v1 }
 0x30a   :  { %1232 = vmatprep.subr.mxu1 %v4064_v26 }
 0x30b   :  { %1233 = vmatpush1.msra.mxu1 %v4070_v61 }
 0x30c   :  { %1234 = vmatprep.subr.mxu1 %v4076_v21 }
 0x30d   :  { %1235 = vmatpush1.msra.mxu1 %v4082_v55 }
 0x30e   :  { %1236 = vmatprep.subr.mxu1 %v4088_v9 }
 0x30f   :  { %1237 = vmatpush1.msra.mxu1 %v4094_v11 }
 0x310   :  { %1238 = vmatprep.subr.mxu1 %v4100_v15 }
 0x311   :  { %1239 = vmatpush1.msra.mxu1 %v4106_v17 }
 0x312   :  { %1426 = vmatprep.subr.mxu1 %v3922_v35 }
 0x3a3   :  { %v1056_v19 = vpop.f32.mrf.mxu1  ;;  %v1127_v23 = vpop.f32.mrf.mxu0 }
 0x3a4   :  { %v1137_v27 = vadd.f32 %v1056_v19, %v4729_v25  ;;  %v1151_v48 = vadd.f32 %v3802_v8, %v1127_v23  ;;  %v4173_v19 = vld [vmem:[%s4662_s5 + $0x148] sm:$0xff]  ;;  %v4180_v23 = vld [vmem:[%s4662_s5 + $0x130] sm:$0xff]  ;;  %v4187_v25 = vld [vmem:[%s4662_s5 + $0x118] sm:$0xff] }
 0x3a5   :  { %v2791_v30 = vpop.f32.mrf.mxu0  ;;  %v1058_v34 = vpop.f32.mrf.mxu1 }
 0x3a6   :  { %v2420_v32 = vmul.f32 -1.442695, %v1137_v27  ;;  %v1144_v38 = vadd.f32 %v1058_v34, %v4730_v36  ;;  %v4194_v27 = vld [vmem:[%s4662_s5 + $0x100] sm:$0xff]  ;;  %v4201_v30 = vld [vmem:[%s4662_s5 + $0xe8] sm:$0xff]  ;;  %v4213_v34 = vld [vmem:[%s4662_s5 + $0xb8] sm:$0xff] }
 0x3a7   :  { %v4220_v36 = vld [vmem:[%s4662_s5 + $0xa0] sm:$0xff] }
 0x3a8   :  { %3033 = vpow2.f32 %v2420_v32  ;;  %v2421_v40 = vmul.f32 -1.442695, %v1144_v38  ;;  %v4206_v32 = vld [vmem:[%s4662_s5 + $0xd0] sm:$0xff]  ;;  %v4227_v38 = vld [vmem:[%s4662_s5 + $0x88] sm:$0xff] }
 0x3aa   :  { %3035 = vpow2.f32 %v2421_v40  ;;  %v4234_v40 = vld [vmem:[%s4662_s5 + $0x70] sm:$0xff] }
 0x3b5   :  { %v3034_v42 = vpop.eup %3033 }
 0x3b6   :  { %v1141_v44 = vadd.f32 1.0, %v3034_v42  ;;  %v4241_v42 = vld [vmem:[%s4662_s5 + $0x58] sm:$0xff] }
 0x3b7   :  { %v3036_v46 = vpop.eup %3035 }
 0x3b8   :  { %3037 = vrcp.f32 %v1141_v44  ;;  %v1148_v56 = vadd.f32 1.0, %v3036_v46  ;;  %v4248_v44 = vld [vmem:[%s4662_s5 + $0x40] sm:$0xff]  ;;  %v4255_v46 = vld [vmem:[%s4662_s5 + $0x28] sm:$0xff] }
 0x3b9   :  { %4732 = vst [vmem:[#allocation11_spill] sm:$0xff] %v4255_v46 }
 0x3c5   :  { %v3038_v50 = vpop.eup %3037 }
 0x3c6   :  { %v1152_v52 = vmul.f32 %v3038_v50, %v1151_v48  ;;  %v4262_v48 = vld [vmem:[%s4662_s5 + $0x10] sm:$0xff] }
 0x3c7   :  { %4733 = vst [vmem:[#allocation12_spill] sm:$0xff] %v4262_v48 }
 0x3c8   :  { %v1153_v54 = vadd.f32 %v1152_v52, %v3789_v28  ;;  %v4159_v28 = vld [vmem:[%s4662_s5 + $0x178] sm:$0xff] }
 0x3ca   :  { %3039 = vtanh.f32 %v1153_v54  ;;  %v4734_v54 = vld [vmem:[#allocation14_spill] sm:$0xff] }
 0x3cb   :  { %3041 = vrcp.f32 %v1148_v56 }
 0x3d7   :  { %v3040_v58 = vpop.eup %3039 }
 0x3d8   :  { %v1155_v60 = vsub.f32 %v3880_v6, %v3040_v58  ;;  %v3042_v62 = vpop.eup %3041 }
 0x3da   :  { %v1156_v0 = vmul.f32 %v3042_v62, %v1155_v60 }
 0x3dc   :  { %v4117_v2 = vadd.f32 %v3040_v58, %v1156_v0  ;;  %v4735_v0 = vld [vmem:[#allocation15_spill] sm:$0xff] }
 0x3de   :  { %4731 = vst [vmem:[#allocation10_spill] sm:$0xff] %v4117_v2  ;;  %1273 = vmatmul.mubr.f32.vlgmr.msra.gmra.mxu1 %v4117_v2  ;;  %2825 = vmatmul.mubr.f32.vlgmr.msra.gmra.mxu0 %v4117_v2 }
 0x3df   :  { %1427 = vmatpush1.msra.mxu1 %v3928_v37  ;;  %1490 = vmatprep.mubr.f32.mxu1 %v4716_v14 }
 0x3e0   :  { %1428 = vmatprep.subr.mxu1 %v3934_v20  ;;  %2859 = vmatprep.mubr.msk.f32.mxu0 %vm3095_vm1, %v4716_v14 }
 0x3e1   :  { %1429 = vmatpush1.msra.mxu1 %v3940_v22  ;;  %2828 = vmatpush3.msra.mxu0 %v4159_v28 }
 0x3e2   :  { %1430 = vmatprep.subr.mxu1 %v3946_v24  ;;  %2829 = vmatprep.subr.mxu0 %v4716_v14 }
 0x3e3   :  { %1431 = vmatpush1.msra.mxu1 %v3952_v29  ;;  %2830 = vmatpush3.msra.mxu0 %v4166_v4 }
 0x3e4   :  { %1432 = vmatprep.subr.mxu1 %v3958_v31  ;;  %2831 = vmatprep.subr.mxu0 %v4716_v14 }
 0x3e5   :  { %1433 = vmatpush1.msra.mxu1 %v3964_v39  ;;  %2832 = vmatpush3.msra.mxu0 %v4173_v19 }
 0x3e6   :  { %1434 = vmatprep.subr.mxu1 %v3970_v41  ;;  %2833 = vmatprep.subr.mxu0 %v4716_v14 }
 0x3e7   :  { %1435 = vmatpush1.msra.mxu1 %v3976_v43  ;;  %2834 = vmatpush3.msra.mxu0 %v4180_v23 }
 0x3e8   :  { %1436 = vmatprep.subr.mxu1 %v3982_v45  ;;  %2835 = vmatprep.subr.mxu0 %v4716_v14 }
 0x3e9   :  { %1437 = vmatpush1.msra.mxu1 %v3988_v47  ;;  %2836 = vmatpush3.msra.mxu0 %v4187_v25 }
 0x3ea   :  { %1438 = vmatprep.subr.mxu1 %v3994_v49  ;;  %2837 = vmatprep.subr.mxu0 %v4716_v14 }
 0x3eb   :  { %1439 = vmatpush1.msra.mxu1 %v4000_v51  ;;  %2838 = vmatpush3.msra.mxu0 %v4194_v27 }
 0x3ec   :  { %1440 = vmatprep.subr.mxu1 %v4005_v16  ;;  %2839 = vmatprep.subr.mxu0 %v4716_v14 }
 0x3ed   :  { %1441 = vmatpush1.msra.mxu1 %v4010_v33  ;;  %2840 = vmatpush3.msra.mxu0 %v4201_v30 }
 0x3ee   :  { %1442 = vmatprep.subr.mxu1 %v4016_v53  ;;  %2841 = vmatprep.subr.mxu0 %v4716_v14 }
 0x3ef   :  { %1443 = vmatpush1.msra.mxu1 %v4022_v5  ;;  %2842 = vmatpush3.msra.mxu0 %v4206_v32 }
 0x3f0   :  { %1444 = vmatprep.subr.mxu1 %v4028_v18  ;;  %2843 = vmatprep.subr.mxu0 %v4716_v14 }
 0x3f1   :  { %1445 = vmatpush1.msra.mxu1 %v4034_v59  ;;  %2844 = vmatpush3.msra.mxu0 %v4213_v34 }
 0x3f2   :  { %1446 = vmatprep.subr.mxu1 %v4040_v12  ;;  %2845 = vmatprep.subr.mxu0 %v4716_v14 }
 0x3f3   :  { %1447 = vmatpush1.msra.mxu1 %v4046_v10  ;;  %2846 = vmatpush3.msra.mxu0 %v4220_v36 }
 0x3f4   :  { %1448 = vmatprep.subr.mxu1 %v4052_v63  ;;  %2847 = vmatprep.subr.mxu0 %v4716_v14 }
 0x3f5   :  { %1449 = vmatpush1.msra.mxu1 %v4058_v1  ;;  %2848 = vmatpush3.msra.mxu0 %v4227_v38 }
 0x3f6   :  { %1450 = vmatprep.subr.mxu1 %v4064_v26  ;;  %2849 = vmatprep.subr.mxu0 %v4716_v14 }
 0x3f7   :  { %1451 = vmatpush1.msra.mxu1 %v4070_v61  ;;  %2850 = vmatpush3.msra.mxu0 %v4234_v40 }
 0x3f8   :  { %1452 = vmatprep.subr.mxu1 %v4076_v21  ;;  %2851 = vmatprep.subr.mxu0 %v4716_v14 }
 0x3f9   :  { %1453 = vmatpush1.msra.mxu1 %v4082_v55  ;;  %2852 = vmatpush3.msra.mxu0 %v4241_v42 }
 0x3fa   :  { %1454 = vmatprep.subr.mxu1 %v4088_v9  ;;  %2853 = vmatprep.subr.mxu0 %v4716_v14 }
 0x3fb   :  { %1455 = vmatpush1.msra.mxu1 %v4094_v11  ;;  %2854 = vmatpush3.msra.mxu0 %v4248_v44 }
 0x3fc   :  { %1456 = vmatprep.subr.mxu1 %v4100_v15  ;;  %2855 = vmatprep.subr.mxu0 %v4716_v14 }
 0x3fd   :  { %1457 = vmatpush1.msra.mxu1 %v4106_v17  ;;  %2856 = vmatpush3.msra.mxu0 %v4255_v46 }
 0x3fe   :  { %1644 = vmatprep.subr.mxu1 %v3922_v35  ;;  %2857 = vmatprep.subr.mxu0 %v4716_v14 }
 0x3ff   :  { %2858 = vmatpush3.msra.mxu0 %v4262_v48 }
 0x400   :  { %2862 = vmatprep.subr.mxu0 %v4716_v14 }
 0x49e   :  { %v1274_v50 = vpop.f32.mrf.mxu1  ;;  %v1345_v52 = vpop.f32.mrf.mxu0 }
 0x49f   :  { %v1355_v56 = vadd.f32 %v1274_v50, %v4734_v54  ;;  %v1369_v48 = vadd.f32 %v3802_v8, %v1345_v52 }
 0x4a0   :  { %v2826_v58 = vpop.f32.mrf.mxu0  ;;  %v1276_v62 = vpop.f32.mrf.mxu1 }
 0x4a1   :  { %v2422_v60 = vmul.f32 -1.442695, %v1355_v56  ;;  %v1362_v6 = vadd.f32 %v1276_v62, %v4735_v0  ;;  %v4743_v0 = vld [vmem:[#allocation17_spill] sm:$0xff] }
 0x4a3   :  { %3043 = vpow2.f32 %v2422_v60  ;;  %v2423_v3 = vmul.f32 -1.442695, %v1362_v6 }
 0x4a5   :  { %3045 = vpow2.f32 %v2423_v3  ;;  %v4736_v3 = vld [vmem:[#allocation6_spill] sm:$0xff] }
 0x4b0   :  { %v3044_v7 = vpop.eup %3043 }
 0x4b1   :  { %v1359_v13 = vadd.f32 1.0, %v3044_v7  ;;  %v4738_v7 = vld [vmem:[#allocation7_spill] sm:$0xff] }
 0x4b2   :  { %v3046_v35 = vpop.eup %3045 }
 0x4b3   :  { %3047 = vrcp.f32 %v1359_v13  ;;  %v1366_v11 = vadd.f32 1.0, %v3046_v35  ;;  %v4739_v13 = vld [vmem:[#allocation9_spill] sm:$0xff]  ;;  %v4740_v35 = vld [vmem:[#allocation12_spill] sm:$0xff] }
 0x4c0   :  { %v3048_v17 = vpop.eup %3047 }
 0x4c1   :  { %v1370_v15 = vmul.f32 %v3048_v17, %v1369_v48 }
 0x4c3   :  { %v1371_v46 = vadd.f32 %v1370_v15, %v3787_v57  ;;  %v4737_v57 = vld [vmem:[#allocation11_spill] sm:$0xff] }
 0x4c5   :  { %3049 = vtanh.f32 %v1371_v46  ;;  %v4742_v46 = vld [vmem:[#allocation16_spill] sm:$0xff] }
 0x4c6   :  { %3051 = vrcp.f32 %v1366_v11  ;;  %v4741_v11 = vld [vmem:[#allocation8_spill] sm:$0xff] }
 0x4d2   :  { %v3050_v50 = vpop.eup %3049 }
 0x4d3   :  { %v1373_v54 = vsub.f32 %v4117_v2, %v3050_v50  ;;  %v3052_v56 = vpop.eup %3051 }
 0x4d5   :  { %v1374_v58 = vmul.f32 %v3052_v56, %v1373_v54 }
 0x4d7   :  { %v4273_v6 = vadd.f32 %v3050_v50, %v1374_v58 }
 0x4d9   :  { %1491 = vmatmul.mubr.f32.vlgmr.msra.gmra.mxu1 %v4273_v6  ;;  %2860 = vmatmul.mubr.f32.vlgmr.msra.gmra.mxu0 %v4273_v6 }
 0x4da   :  { %1645 = vmatpush1.msra.mxu1 %v3928_v37  ;;  %2863 = vmatpush3.msra.mxu0 %v4159_v28 }
 0x4db   :  { %1646 = vmatprep.subr.mxu1 %v3934_v20  ;;  %2864 = vmatprep.subr.mxu0 %v4716_v14 }
 0x4dc   :  { %1647 = vmatpush1.msra.mxu1 %v3940_v22  ;;  %2865 = vmatpush3.msra.mxu0 %v4166_v4 }
 0x4dd   :  { %1648 = vmatprep.subr.mxu1 %v3946_v24  ;;  %2866 = vmatprep.subr.mxu0 %v4716_v14 }
 0x4de   :  { %1649 = vmatpush1.msra.mxu1 %v3952_v29  ;;  %2867 = vmatpush3.msra.mxu0 %v4173_v19 }
 0x4df   :  { %1650 = vmatprep.subr.mxu1 %v3958_v31  ;;  %2868 = vmatprep.subr.mxu0 %v4716_v14 }
 0x4e0   :  { %1651 = vmatpush1.msra.mxu1 %v3964_v39  ;;  %2869 = vmatpush3.msra.mxu0 %v4180_v23 }
 0x4e1   :  { %1652 = vmatprep.subr.mxu1 %v3970_v41  ;;  %2870 = vmatprep.subr.mxu0 %v4716_v14 }
 0x4e2   :  { %1653 = vmatpush1.msra.mxu1 %v3976_v43  ;;  %2871 = vmatpush3.msra.mxu0 %v4187_v25 }
 0x4e3   :  { %1654 = vmatprep.subr.mxu1 %v3982_v45  ;;  %2872 = vmatprep.subr.mxu0 %v4716_v14 }
 0x4e4   :  { %1655 = vmatpush1.msra.mxu1 %v3988_v47  ;;  %2873 = vmatpush3.msra.mxu0 %v4194_v27 }
 0x4e5   :  { %1656 = vmatprep.subr.mxu1 %v3994_v49  ;;  %2874 = vmatprep.subr.mxu0 %v4716_v14 }
 0x4e6   :  { %1657 = vmatpush1.msra.mxu1 %v4000_v51  ;;  %2875 = vmatpush3.msra.mxu0 %v4201_v30 }
 0x4e7   :  { %1658 = vmatprep.subr.mxu1 %v4005_v16  ;;  %2876 = vmatprep.subr.mxu0 %v4716_v14 }
 0x4e8   :  { %1659 = vmatpush1.msra.mxu1 %v4010_v33  ;;  %2877 = vmatpush3.msra.mxu0 %v4206_v32 }
 0x4e9   :  { %1660 = vmatprep.subr.mxu1 %v4016_v53  ;;  %2878 = vmatprep.subr.mxu0 %v4716_v14 }
 0x4ea   :  { %1661 = vmatpush1.msra.mxu1 %v4022_v5  ;;  %2879 = vmatpush3.msra.mxu0 %v4213_v34 }
 0x4eb   :  { %1662 = vmatprep.subr.mxu1 %v4028_v18  ;;  %2880 = vmatprep.subr.mxu0 %v4716_v14 }
 0x4ec   :  { %1663 = vmatpush1.msra.mxu1 %v4034_v59  ;;  %2881 = vmatpush3.msra.mxu0 %v4220_v36 }
 0x4ed   :  { %1664 = vmatprep.subr.mxu1 %v4040_v12  ;;  %2882 = vmatprep.subr.mxu0 %v4716_v14 }
 0x4ee   :  { %1665 = vmatpush1.msra.mxu1 %v4046_v10  ;;  %2883 = vmatpush3.msra.mxu0 %v4227_v38 }
 0x4ef   :  { %1666 = vmatprep.subr.mxu1 %v4052_v63  ;;  %2884 = vmatprep.subr.mxu0 %v4716_v14 }
 0x4f0   :  { %1667 = vmatpush1.msra.mxu1 %v4058_v1  ;;  %2885 = vmatpush3.msra.mxu0 %v4234_v40 }
 0x4f1   :  { %1668 = vmatprep.subr.mxu1 %v4064_v26  ;;  %2886 = vmatprep.subr.mxu0 %v4716_v14 }
 0x4f2   :  { %1669 = vmatpush1.msra.mxu1 %v4070_v61  ;;  %2887 = vmatpush3.msra.mxu0 %v4241_v42 }
 0x4f3   :  { %1670 = vmatprep.subr.mxu1 %v4076_v21  ;;  %2888 = vmatprep.subr.mxu0 %v4716_v14 }
 0x4f4   :  { %1671 = vmatpush1.msra.mxu1 %v4082_v55  ;;  %2889 = vmatpush3.msra.mxu0 %v4248_v44 }
 0x4f5   :  { %1672 = vmatprep.subr.mxu1 %v4088_v9  ;;  %2890 = vmatprep.subr.mxu0 %v4716_v14 }
 0x4f6   :  { %1673 = vmatpush1.msra.mxu1 %v4736_v3  ;;  %2891 = vmatpush3.msra.mxu0 %v4737_v57 }
 0x4f7   :  { %1674 = vmatprep.subr.mxu1 %v4738_v7  ;;  %2892 = vmatprep.subr.mxu0 %v4716_v14  ;;  %v4744_v7 = vld [vmem:[#allocation25_spill] sm:$0xff] }
 0x4f8   :  { %1675 = vmatpush1.msra.mxu1 %v4739_v13  ;;  %1708 = vmatprep.mubr.f32.mxu1 %v4716_v14 }
 0x4f9   :  { %2893 = vmatpush3.msra.mxu0 %v4740_v35  ;;  %2894 = vmatprep.mubr.msk.f32.mxu0 %vm3095_vm1, %v4716_v14 }
 0x4fa   :  { %1862 = vmatprep.subr.mxu1 %v4741_v11  ;;  %2897 = vmatprep.subr.mxu0 %v4716_v14 }
 0x599   :  { %v1492_v15 = vpop.f32.mrf.mxu1  ;;  %v1563_v17 = vpop.f32.mrf.mxu0 }
 0x59a   :  { %v1573_v48 = vadd.f32 %v1492_v15, %v4742_v46  ;;  %v1587_v11 = vadd.f32 %v3802_v8, %v1563_v17  ;;  %v4745_v8 = vld [vmem:[#allocation6_spill] sm:$0xff]  ;;  %v2048_v17 = vld [vmem:[%s4662_s5 + $0x80] sm:$0xff] }
 0x59b   :  { %v2861_v52 = vpop.f32.mrf.mxu0  ;;  %v1494_v62 = vpop.f32.mrf.mxu1 }
 0x59c   :  { %v2424_v60 = vmul.f32 -1.442695, %v1573_v48  ;;  %v1580_v50 = vadd.f32 %v1494_v62, %v4743_v0  ;;  %v2047_v62 = vld [vmem:[%s4662_s5 + $0x78] sm:$0xff]  ;;  %v2045_v0 = vld [vmem:[%s4662_s5 + $0x68] sm:$0xff] }
 0x59e   :  { %3053 = vpow2.f32 %v2424_v60  ;;  %v2425_v54 = vmul.f32 -1.442695, %v1580_v50  ;;  %v2044_v50 = vld [vmem:[%s4662_s5 + $0x60] sm:$0xff] }
 0x5a0   :  { %3055 = vpow2.f32 %v2425_v54  ;;  %v2042_v54 = vld [vmem:[%s4662_s5 + $0x50] sm:$0xff] }
 0x5ab   :  { %v3054_v56 = vpop.eup %3053 }
 0x5ac   :  { %v1577_v58 = vadd.f32 1.0, %v3054_v56  ;;  %v2041_v56 = vld [vmem:[%s4662_s5 + $0x48] sm:$0xff] }
 0x5ad   :  { %v3056_v2 = vpop.eup %3055 }
 0x5ae   :  { %3057 = vrcp.f32 %v1577_v58  ;;  %v1584_v3 = vadd.f32 1.0, %v3056_v2  ;;  %v2039_v58 = vld [vmem:[%s4662_s5 + $0x38] sm:$0xff] }
 0x5bb   :  { %v3058_v35 = vpop.eup %3057 }
 0x5bc   :  { %v1588_v13 = vmul.f32 %v3058_v35, %v1587_v11  ;;  %v2050_v35 = vld [vmem:[%s4662_s5 + $0x90] sm:$0xff] }
 0x5bd   :  { %v2038_v11 = vld [vmem:[%s4662_s5 + $0x30] sm:$0xff] }
 0x5be   :  { %v1589_v57 = vadd.f32 %v1588_v13, %v4744_v7  ;;  %v2053_v7 = vld [vmem:[%s4662_s5 + $0xa8] sm:$0xff]  ;;  %v2051_v13 = vld [vmem:[%s4662_s5 + $0x98] sm:$0xff] }
 0x5c0   :  { %3059 = vtanh.f32 %v1589_v57  ;;  %v2054_v57 = vld [vmem:[%s4662_s5 + $0xb0] sm:$0xff] }
 0x5c1   :  { %3061 = vrcp.f32 %v1584_v3  ;;  %v2056_v3 = vld [vmem:[%s4662_s5 + $0xc0] sm:$0xff] }
 0x5cd   :  { %v3060_v15 = vpop.eup %3059 }
 0x5ce   :  { %v1591_v46 = vsub.f32 %v4273_v6, %v3060_v15  ;;  %v3062_v48 = vpop.eup %3061 }
 0x5d0   :  { %v1592_v52 = vmul.f32 %v3062_v48, %v1591_v46  ;;  %v2035_v46 = vld [vmem:[%s4662_s5 + $0x18] sm:$0xff]  ;;  %v2033_v48 = vld [vmem:[%s4662_s5 + $0x8] sm:$0xff] }
 0x5d2   :  { %v4349_v60 = vadd.f32 %v3060_v15, %v1592_v52  ;;  %v2036_v15 = vld [vmem:[%s4662_s5 + $0x20] sm:$0xff] }
 0x5d3   :  { %v2032_v52 = vld [vmem:[%s4662_s5] sm:$0xff] }
 0x5d4   :  { %1709 = vmatmul.mubr.f32.vlgmr.msra.gmra.mxu1 %v4349_v60  ;;  %2895 = vmatmul.mubr.f32.vlgmr.msra.gmra.mxu0 %v4349_v60 }
 0x5d5   :  { %1863 = vmatpush1.msra.mxu1 %v3928_v37  ;;  %2898 = vmatpush3.msra.mxu0 %v4159_v28  ;;  %v4746_v37 = vld [vmem:[#allocation11_spill] sm:$0xff] }
 0x5d6   :  { %1864 = vmatprep.subr.mxu1 %v3934_v20  ;;  %2899 = vmatprep.subr.mxu0 %v4716_v14  ;;  %v4747_v20 = vld [vmem:[#allocation7_spill] sm:$0xff] }
 0x5d7   :  { %1865 = vmatpush1.msra.mxu1 %v3940_v22  ;;  %2900 = vmatpush3.msra.mxu0 %v4166_v4  ;;  %v4748_v22 = vld [vmem:[#allocation9_spill] sm:$0xff] }
 0x5d8   :  { %1866 = vmatprep.subr.mxu1 %v3946_v24  ;;  %2901 = vmatprep.subr.mxu0 %v4716_v14  ;;  %v4749_v24 = vld [vmem:[#allocation12_spill] sm:$0xff] }
 0x5d9   :  { %1867 = vmatpush1.msra.mxu1 %v3952_v29  ;;  %2902 = vmatpush3.msra.mxu0 %v4173_v19 }
 0x5da   :  { %1868 = vmatprep.subr.mxu1 %v3958_v31  ;;  %2903 = vmatprep.subr.mxu0 %v4716_v14 }
 0x5db   :  { %1869 = vmatpush1.msra.mxu1 %v3964_v39  ;;  %2904 = vmatpush3.msra.mxu0 %v4180_v23  ;;  %v4750_v39 = vld [vmem:[#allocation18_spill] sm:$0xff] }
 0x5dc   :  { %1870 = vmatprep.subr.mxu1 %v3970_v41  ;;  %2905 = vmatprep.subr.mxu0 %v4716_v14 }
 0x5dd   :  { %1871 = vmatpush1.msra.mxu1 %v3976_v43  ;;  %2906 = vmatpush3.msra.mxu0 %v4187_v25 }
 0x5de   :  { %1872 = vmatprep.subr.mxu1 %v3982_v45  ;;  %2907 = vmatprep.subr.mxu0 %v4716_v14 }
 0x5df   :  { %1873 = vmatpush1.msra.mxu1 %v3988_v47  ;;  %2908 = vmatpush3.msra.mxu0 %v4194_v27 }
 0x5e0   :  { %1874 = vmatprep.subr.mxu1 %v3994_v49  ;;  %2909 = vmatprep.subr.mxu0 %v4716_v14  ;;  %v4751_v49 = vld [vmem:[#allocation19_spill] sm:$0xff] }
 0x5e1   :  { %1875 = vmatpush1.msra.mxu1 %v4000_v51  ;;  %2910 = vmatpush3.msra.mxu0 %v4201_v30 }
 0x5e2   :  { %1876 = vmatprep.subr.mxu1 %v4005_v16  ;;  %2911 = vmatprep.subr.mxu0 %v4716_v14 }
 0x5e3   :  { %1877 = vmatpush1.msra.mxu1 %v4010_v33  ;;  %2912 = vmatpush3.msra.mxu0 %v4206_v32 }
 0x5e4   :  { %1878 = vmatprep.subr.mxu1 %v4016_v53  ;;  %2913 = vmatprep.subr.mxu0 %v4716_v14 }
 0x5e5   :  { %1879 = vmatpush1.msra.mxu1 %v4022_v5  ;;  %2914 = vmatpush3.msra.mxu0 %v4213_v34 }
 0x5e6   :  { %1880 = vmatprep.subr.mxu1 %v4028_v18  ;;  %2915 = vmatprep.subr.mxu0 %v4716_v14  ;;  %v4424_v18 = vld [vmem:[%s4665_s6] ss:$0 sm:$0xff] }
 0x5e7   :  { %1881 = vmatpush1.msra.mxu1 %v4034_v59  ;;  %2916 = vmatpush3.msra.mxu0 %v4220_v36 }
 0x5e8   :  { %1882 = vmatprep.subr.mxu1 %v4040_v12  ;;  %2917 = vmatprep.subr.mxu0 %v4716_v14 }
 0x5e9   :  { %1883 = vmatpush1.msra.mxu1 %v4046_v10  ;;  %2918 = vmatpush3.msra.mxu0 %v4227_v38 }
 0x5ea   :  { %1884 = vmatprep.subr.mxu1 %v4052_v63  ;;  %2919 = vmatprep.subr.mxu0 %v4716_v14  ;;  %v4752_v63 = vld [vmem:[#allocation24_spill] sm:$0xff] }
 0x5eb   :  { %1885 = vmatpush1.msra.mxu1 %v4058_v1  ;;  %2920 = vmatpush3.msra.mxu0 %v4234_v40 }
 0x5ec   :  { %1886 = vmatprep.subr.mxu1 %v4064_v26  ;;  %2921 = vmatprep.subr.mxu0 %v4716_v14 }
 0x5ed   :  { %1887 = vmatpush1.msra.mxu1 %v4070_v61  ;;  %2922 = vmatpush3.msra.mxu0 %v4241_v42 }
 0x5ee   :  { %1888 = vmatprep.subr.mxu1 %v4076_v21  ;;  %2923 = vmatprep.subr.mxu0 %v4716_v14 }
 0x5ef   :  { %1889 = vmatpush1.msra.mxu1 %v4082_v55  ;;  %2924 = vmatpush3.msra.mxu0 %v4248_v44 }
 0x5f0   :  { %1890 = vmatprep.subr.mxu1 %v4088_v9  ;;  %2925 = vmatprep.subr.mxu0 %v4716_v14 }
 0x5f1   :  { %1891 = vmatpush1.msra.mxu1 %v4745_v8  ;;  %2926 = vmatpush3.msra.mxu0 %v4746_v37  ;;  %v2274_v8 = vld [vmem:[%s4666_s7 + $0x78] sm:$0xff] }
 0x5f2   :  { %1892 = vmatprep.subr.mxu1 %v4747_v20  ;;  %2927 = vmatprep.subr.mxu0 %v4716_v14 }
 0x5f3   :  { %1893 = vmatpush1.msra.mxu1 %v4748_v22  ;;  %1926 = vmatprep.mubr.f32.mxu1 %v4716_v14  ;;  %v4753_v22 = vld [vmem:[#allocation20_spill] sm:$0xff] }
 0x5f4   :  { %2928 = vmatpush3.msra.mxu0 %v4749_v24  ;;  %2929 = vmatprep.mubr.msk.f32.mxu0 %vm3095_vm1, %v4716_v14 }
 0x5f5   :  { %2932 = vmatprep.subr.mxu0 %v4716_v14 }
 0x694   :  { %v1710_v29 = vpop.f32.mrf.mxu1  ;;  %v1781_v31 = vpop.f32.mrf.mxu0 }
 0x695   :  { %v1791_v41 = vadd.f32 %v1710_v29, %v4750_v39  ;;  %v1805_v59 = vadd.f32 %v4424_v18, %v1781_v31 }
 0x696   :  { %v2896_v43 = vpop.f32.mrf.mxu0  ;;  %v1712_v47 = vpop.f32.mrf.mxu1 }
 0x697   :  { %v2426_v45 = vmul.f32 -1.442695, %v1791_v41  ;;  %v1798_v51 = vadd.f32 %v1712_v47, %v4751_v49  ;;  %v4754_v41 = vld [vmem:[#allocation21_spill] sm:$0xff] }
 0x699   :  { %3063 = vpow2.f32 %v2426_v45  ;;  %v2427_v16 = vmul.f32 -1.442695, %v1798_v51 }
 0x69b   :  { %3065 = vpow2.f32 %v2427_v16 }
 0x6a6   :  { %v3064_v33 = vpop.eup %3063 }
 0x6a7   :  { %v1795_v53 = vadd.f32 1.0, %v3064_v33 }
 0x6a8   :  { %v3066_v5 = vpop.eup %3065 }
 0x6a9   :  { %3067 = vrcp.f32 %v1795_v53  ;;  %v1802_v26 = vadd.f32 1.0, %v3066_v5  ;;  %v4755_v5 = vld [vmem:[#allocation27_spill] sm:$0xff] }
 0x6b6   :  { %v3068_v12 = vpop.eup %3067 }
 0x6b7   :  { %v1806_v10 = vmul.f32 %v3068_v12, %v1805_v59 }
 0x6b9   :  { %v1807_v1 = vadd.f32 %v1806_v10, %v4752_v63 }
 0x6bb   :  { %3069 = vtanh.f32 %v1807_v1 }
 0x6bc   :  { %3071 = vrcp.f32 %v1802_v26 }
 0x6c8   :  { %v3070_v61 = vpop.eup %3069 }
 0x6c9   :  { %v1809_v21 = vsub.f32 %v4349_v60, %v3070_v61  ;;  %v3072_v55 = vpop.eup %3071 }
 0x6cb   :  { %v1810_v9 = vmul.f32 %v3072_v55, %v1809_v21  ;;  %v2273_v21 = vld [vmem:[%s4666_s7 + $0x70] sm:$0xff]  ;;  %v4756_v55 = vld [vmem:[#allocation28_spill] sm:$0xff] }
 0x6cd   :  { %v4429_v2 = vadd.f32 %v3070_v61, %v1810_v9  ;;  %v2272_v9 = vld [vmem:[%s4666_s7 + $0x68] sm:$0xff] }
 0x6cf   :  { %1927 = vmatmul.mubr.f32.vlgmr.msra.gmra.mxu1 %v4429_v2  ;;  %2930 = vmatmul.mubr.f32.vlgmr.msra.gmra.mxu0 %v4429_v2 }
 0x6d0   :  { %2933 = vmatpush3.msra.mxu0 %v4159_v28  ;;  %2144 = vmatprep.mubr.f32.mxu1 %v4716_v14  ;;  %v2078_v28 = vld [vmem:[%s4662_s5 + $0x170] sm:$0xff] }
 0x6d1   :  { %2934 = vmatprep.subr.mxu0 %v4716_v14  ;;  %2964 = vmatprep.mubr.msk.f32.mxu0 %vm3095_vm1, %v4716_v14 }
 0x6d2   :  { %2935 = vmatpush3.msra.mxu0 %v4166_v4  ;;  %2080 = vmatprep.subr.mxu1 %v2078_v28  ;;  %v2077_v4 = vld [vmem:[%s4662_s5 + $0x168] sm:$0xff]  ;;  %v2271_v28 = vld [vmem:[%s4666_s7 + $0x60] sm:$0xff] }
 0x6d3   :  { %2936 = vmatprep.subr.mxu0 %v4716_v14  ;;  %2081 = vmatpush1.msra.mxu1 %v2077_v4  ;;  %v2270_v4 = vld [vmem:[%s4666_s7 + $0x58] sm:$0xff] }
 0x6d4   :  { %2937 = vmatpush3.msra.mxu0 %v4173_v19  ;;  %v2075_v19 = vld [vmem:[%s4662_s5 + $0x158] sm:$0xff] }
 0x6d5   :  { %2938 = vmatprep.subr.mxu0 %v4716_v14  ;;  %2082 = vmatprep.subr.mxu1 %v2075_v19  ;;  %v2269_v19 = vld [vmem:[%s4666_s7 + $0x50] sm:$0xff] }
 0x6d6   :  { %2939 = vmatpush3.msra.mxu0 %v4180_v23  ;;  %v2072_v23 = vld [vmem:[%s4662_s5 + $0x140] sm:$0xff] }
 0x6d7   :  { %2940 = vmatprep.subr.mxu0 %v4716_v14 }
 0x6d8   :  { %2941 = vmatpush3.msra.mxu0 %v4187_v25  ;;  %v2071_v25 = vld [vmem:[%s4662_s5 + $0x138] sm:$0xff] }
 0x6d9   :  { %2942 = vmatprep.subr.mxu0 %v4716_v14 }
 0x6da   :  { %2943 = vmatpush3.msra.mxu0 %v4194_v27  ;;  %v2069_v27 = vld [vmem:[%s4662_s5 + $0x128] sm:$0xff] }
 0x6db   :  { %2944 = vmatprep.subr.mxu0 %v4716_v14 }
 0x6dc   :  { %2945 = vmatpush3.msra.mxu0 %v4201_v30  ;;  %v2068_v30 = vld [vmem:[%s4662_s5 + $0x120] sm:$0xff] }
 0x6dd   :  { %2946 = vmatprep.subr.mxu0 %v4716_v14 }
 0x6de   :  { %2947 = vmatpush3.msra.mxu0 %v4206_v32  ;;  %v2066_v32 = vld [vmem:[%s4662_s5 + $0x110] sm:$0xff] }
 0x6df   :  { %2948 = vmatprep.subr.mxu0 %v4716_v14 }
 0x6e0   :  { %2949 = vmatpush3.msra.mxu0 %v4213_v34  ;;  %v2065_v34 = vld [vmem:[%s4662_s5 + $0x108] sm:$0xff] }
 0x6e1   :  { %2950 = vmatprep.subr.mxu0 %v4716_v14 }
 0x6e2   :  { %2951 = vmatpush3.msra.mxu0 %v4220_v36  ;;  %v2063_v36 = vld [vmem:[%s4662_s5 + $0xf8] sm:$0xff] }
 0x6e3   :  { %2952 = vmatprep.subr.mxu0 %v4716_v14 }
 0x6e4   :  { %2953 = vmatpush3.msra.mxu0 %v4227_v38  ;;  %v2062_v38 = vld [vmem:[%s4662_s5 + $0xf0] sm:$0xff] }
 0x6e5   :  { %2954 = vmatprep.subr.mxu0 %v4716_v14 }
 0x6e6   :  { %2955 = vmatpush3.msra.mxu0 %v4234_v40  ;;  %v2060_v40 = vld [vmem:[%s4662_s5 + $0xe0] sm:$0xff] }
 0x6e7   :  { %2956 = vmatprep.subr.mxu0 %v4716_v14 }
 0x6e8   :  { %2957 = vmatpush3.msra.mxu0 %v4241_v42  ;;  %v2059_v42 = vld [vmem:[%s4662_s5 + $0xd8] sm:$0xff] }
 0x6e9   :  { %2958 = vmatprep.subr.mxu0 %v4716_v14 }
 0x6ea   :  { %2959 = vmatpush3.msra.mxu0 %v4248_v44  ;;  %v2057_v44 = vld [vmem:[%s4662_s5 + $0xc8] sm:$0xff] }
 0x6eb   :  { %2960 = vmatprep.subr.mxu0 %v4716_v14 }
 0x6ec   :  { %2961 = vmatpush3.msra.mxu0 %v4746_v37 }
 0x6ed   :  { %2962 = vmatprep.subr.mxu0 %v4716_v14  ;;  %v2074_v14 = vld [vmem:[%s4662_s5 + $0x150] sm:$0xff] }
 0x6ee   :  { %2963 = vmatpush3.msra.mxu0 %v4749_v24  ;;  %2083 = vmatpush1.msra.mxu1 %v2074_v14  ;;  %v2268_v14 = vld [vmem:[%s4666_s7 + $0x48] sm:$0xff] }
 0x6ef   :  { %2084 = vmatprep.subr.mxu1 %v2072_v23  ;;  %v2267_v23 = vld [vmem:[%s4666_s7 + $0x40] sm:$0xff] }
 0x6f0   :  { %2085 = vmatpush1.msra.mxu1 %v2071_v25  ;;  %v2266_v25 = vld [vmem:[%s4666_s7 + $0x38] sm:$0xff] }
 0x6f1   :  { %2086 = vmatprep.subr.mxu1 %v2069_v27  ;;  %v2265_v27 = vld [vmem:[%s4666_s7 + $0x30] sm:$0xff] }
 0x6f2   :  { %2087 = vmatpush1.msra.mxu1 %v2068_v30  ;;  %v2264_v30 = vld [vmem:[%s4666_s7 + $0x28] sm:$0xff] }
 0x6f3   :  { %2088 = vmatprep.subr.mxu1 %v2066_v32  ;;  %v2263_v32 = vld [vmem:[%s4666_s7 + $0x20] sm:$0xff] }
 0x6f4   :  { %2089 = vmatpush1.msra.mxu1 %v2065_v34  ;;  %v2262_v34 = vld [vmem:[%s4666_s7 + $0x18] sm:$0xff] }
 0x6f5   :  { %2090 = vmatprep.subr.mxu1 %v2063_v36  ;;  %v2261_v36 = vld [vmem:[%s4666_s7 + $0x10] sm:$0xff] }
 0x6f6   :  { %2091 = vmatpush1.msra.mxu1 %v2062_v38  ;;  %v2260_v38 = vld [vmem:[%s4666_s7 + $0x8] sm:$0xff] }
 0x6f7   :  { %2092 = vmatprep.subr.mxu1 %v2060_v40  ;;  %v2259_v40 = vld [vmem:[%s4666_s7] sm:$0xff] }
 0x6f8   :  { %2093 = vmatpush1.msra.mxu1 %v2059_v42  ;;  %v4757_v42 = vld [vmem:[#allocation5_spill] sm:$0xff] }
 0x6f9   :  { %2094 = vmatprep.subr.mxu1 %v2057_v44  ;;  %v4758_v44 = vld [vmem:[#allocation10_spill] sm:$0xff] }
 0x6fa   :  { %2095 = vmatpush1.msra.mxu1 %v2056_v3 }
 0x6fb   :  { %2096 = vmatprep.subr.mxu1 %v2054_v57 }
 0x6fc   :  { %2097 = vmatpush1.msra.mxu1 %v2053_v7  ;;  %v4759_v7 = vld [vmem:[#allocation22_spill] sm:$0xff] }
 0x6fd   :  { %2098 = vmatprep.subr.mxu1 %v2051_v13 }
 0x6fe   :  { %2099 = vmatpush1.msra.mxu1 %v2050_v35 }
 0x6ff   :  { %2100 = vmatprep.subr.mxu1 %v2048_v17 }
 0x700   :  { %2101 = vmatpush1.msra.mxu1 %v2047_v62 }
 0x701   :  { %2102 = vmatprep.subr.mxu1 %v2045_v0  ;;  %v4760_v0 = vld [vmem:[#allocation23_spill] sm:$0xff] }
 0x702   :  { %2103 = vmatpush1.msra.mxu1 %v2044_v50 }
 0x703   :  { %2104 = vmatprep.subr.mxu1 %v2042_v54 }
 0x704   :  { %2105 = vmatpush1.msra.mxu1 %v2041_v56 }
 0x705   :  { %2106 = vmatprep.subr.mxu1 %v2039_v58 }
 0x706   :  { %2107 = vmatpush1.msra.mxu1 %v2038_v11 }
 0x707   :  { %2108 = vmatprep.subr.mxu1 %v2036_v15 }
 0x708   :  { %2109 = vmatpush1.msra.mxu1 %v2035_v46 }
 0x709   :  { %2110 = vmatprep.subr.mxu1 %v2033_v48 }
 0x70a   :  { %2111 = vmatpush1.msra.mxu1 %v2032_v52 }
 0x70b   :  { %2967 = vmatprep.subr.mxu1 %v2274_v8 }
 0x78f   :  { %v1928_v37 = vpop.f32.mrf.mxu1  ;;  %v1999_v20 = vpop.f32.mrf.mxu0 }
 0x790   :  { %v2009_v24 = vadd.f32 %v1928_v37, %v4753_v22  ;;  %v2023_v16 = vadd.f32 %v4424_v18, %v1999_v20  ;;  %v4761_v20 = vld [vmem:[#allocation26_spill] sm:$0xff] }
 0x791   :  { %v2931_v29 = vpop.f32.mrf.mxu0  ;;  %v1930_v39 = vpop.f32.mrf.mxu1 }
 0x792   :  { %v2428_v31 = vmul.f32 -1.442695, %v2009_v24  ;;  %v2016_v43 = vadd.f32 %v1930_v39, %v4754_v41 }
 0x794   :  { %3073 = vpow2.f32 %v2428_v31  ;;  %v2429_v45 = vmul.f32 -1.442695, %v2016_v43 }
 0x796   :  { %3075 = vpow2.f32 %v2429_v45 }
 0x7a1   :  { %v3074_v47 = vpop.eup %3073 }
 0x7a2   :  { %v2013_v49 = vadd.f32 1.0, %v3074_v47 }
 0x7a3   :  { %v3076_v51 = vpop.eup %3075 }
 0x7a4   :  { %3077 = vrcp.f32 %v2013_v49  ;;  %v2020_v12 = vadd.f32 1.0, %v3076_v51 }
 0x7b1   :  { %v3078_v33 = vpop.eup %3077 }
 0x7b2   :  { %v2024_v53 = vmul.f32 %v3078_v33, %v2023_v16 }
 0x7b4   :  { %v2025_v59 = vadd.f32 %v2024_v53, %v4755_v5 }
 0x7b6   :  { %3079 = vtanh.f32 %v2025_v59 }
 0x7b7   :  { %3081 = vrcp.f32 %v2020_v12 }
 0x7c3   :  { %v3080_v10 = vpop.eup %3079 }
 0x7c4   :  { %v2027_v63 = vsub.f32 %v4429_v2, %v3080_v10  ;;  %v3082_v1 = vpop.eup %3081 }
 0x7c6   :  { %v2028_v26 = vmul.f32 %v3082_v1, %v2027_v63 }
 0x7c8   :  { %v4571_v61 = vadd.f32 %v3080_v10, %v2028_v26 }
 0x7ca   :  { %2145 = vmatmul.mubr.f32.vlgmr.msra.gmra.mxu1 %v4571_v61  ;;  %2965 = vmatmul.mubr.f32.vlgmr.msra.gmra.mxu0 %v4571_v61 }
 0x7cb   :  { %2968 = vmatpush3.msra.mxu1 %v2274_v8  ;;  %2999 = vmatprep.mubr.f32.mxu1 %v4756_v55 }
 0x7cc   :  { %2969 = vmatprep.subr.mxu1 %v2273_v21 }
 0x7cd   :  { %2970 = vmatpush3.msra.mxu1 %v2273_v21 }
 0x7ce   :  { %2971 = vmatprep.subr.mxu1 %v2272_v9 }
 0x7cf   :  { %2972 = vmatpush3.msra.mxu1 %v2272_v9 }
 0x7d0   :  { %2973 = vmatprep.subr.mxu1 %v2271_v28 }
 0x7d1   :  { %2974 = vmatpush3.msra.mxu1 %v2271_v28 }
 0x7d2   :  { %2975 = vmatprep.subr.mxu1 %v2270_v4 }
 0x7d3   :  { %2976 = vmatpush3.msra.mxu1 %v2270_v4 }
 0x7d4   :  { %2977 = vmatprep.subr.mxu1 %v2269_v19 }
 0x7d5   :  { %2978 = vmatpush3.msra.mxu1 %v2269_v19 }
 0x7d6   :  { %2979 = vmatprep.subr.mxu1 %v2268_v14 }
 0x7d7   :  { %2980 = vmatpush3.msra.mxu1 %v2268_v14 }
 0x7d8   :  { %2981 = vmatprep.subr.mxu1 %v2267_v23 }
 0x7d9   :  { %2982 = vmatpush3.msra.mxu1 %v2267_v23 }
 0x7da   :  { %2983 = vmatprep.subr.mxu1 %v2266_v25 }
 0x7db   :  { %2984 = vmatpush3.msra.mxu1 %v2266_v25 }
 0x7dc   :  { %2985 = vmatprep.subr.mxu1 %v2265_v27 }
 0x7dd   :  { %2986 = vmatpush3.msra.mxu1 %v2265_v27 }
 0x7de   :  { %2987 = vmatprep.subr.mxu1 %v2264_v30 }
 0x7df   :  { %2988 = vmatpush3.msra.mxu1 %v2264_v30 }
 0x7e0   :  { %2989 = vmatprep.subr.mxu1 %v2263_v32 }
 0x7e1   :  { %2990 = vmatpush3.msra.mxu1 %v2263_v32 }
 0x7e2   :  { %2991 = vmatprep.subr.mxu1 %v2262_v34 }
 0x7e3   :  { %2992 = vmatpush3.msra.mxu1 %v2262_v34 }
 0x7e4   :  { %2993 = vmatprep.subr.mxu1 %v2261_v36 }
 0x7e5   :  { %2994 = vmatpush3.msra.mxu1 %v2261_v36 }
 0x7e6   :  { %2995 = vmatprep.subr.mxu1 %v2260_v38 }
 0x7e7   :  { %2996 = vmatpush3.msra.mxu1 %v2260_v38 }
 0x7e8   :  { %2997 = vmatprep.subr.mxu1 %v2259_v40 }
 0x7e9   :  { %2998 = vmatpush3.msra.mxu1 %v2259_v40 }
 0x7ea   :  { %3000 = vmatmul.mubr.f32.vlgmr.msra.gmra.mxu1 %v4757_v42 }
 0x7eb   :  { %3002 = vmatprep.mubr.f32.mxu1 %v4758_v44 }
 0x7ee   :  { %3003 = vmatmul.mubr.f32.gmra.mxu1 %v4273_v6  ;;  %v2432_v6 = vld [vmem:[%s4667_s8] ss:$0 sm:$0xff] }
 0x7ef   :  { %3005 = vmatprep.mubr.f32.mxu1 %v4349_v60 }
 0x7f2   :  { %3006 = vmatmul.mubr.f32.gmra.mxu1 %v4429_v2 }
 0x7f3   :  { %3008 = vmatprep.mubr.f32.mxu1 %v4571_v61 }
 0x88a   :  { %v2146_v3 = vpop.f32.mrf.mxu1  ;;  %v2217_v57 = vpop.f32.mrf.mxu0 }
 0x88b   :  { %v2227_v13 = vadd.f32 %v2146_v3, %v4759_v7  ;;  %v2241_v11 = vadd.f32 %v4424_v18, %v2217_v57 }
 0x88c   :  { %v2966_v35 = vpop.f32.mrf.mxu0  ;;  %v2148_v62 = vpop.f32.mrf.mxu1 }
 0x88d   :  { %v2430_v17 = vmul.f32 -1.442695, %v2227_v13  ;;  %v2234_v50 = vadd.f32 %v2148_v62, %v4760_v0 }
 0x88f   :  { %3083 = vpow2.f32 %v2430_v17  ;;  %v2431_v54 = vmul.f32 -1.442695, %v2234_v50 }
 0x891   :  { %3085 = vpow2.f32 %v2431_v54 }
 0x89c   :  { %v3084_v56 = vpop.eup %3083 }
 0x89d   :  { %v2231_v58 = vadd.f32 1.0, %v3084_v56 }
 0x89e   :  { %v3086_v2 = vpop.eup %3085 }
 0x89f   :  { %3087 = vrcp.f32 %v2231_v58  ;;  %v2238_v24 = vadd.f32 1.0, %v3086_v2 }
 0x8aa   :  { %v3001_v60 = vpop.f32.mrf.mxu1 }
 0x8ab   :  { %v2354_v15 = vadd.f32 %v3001_v60, %v2432_v6 }
 0x8ac   :  { %v3088_v46 = vpop.eup %3087  ;;  %v2348_v48 = vpop.f32.mrf.mxu1 }
 0x8ad   :  { %v2242_v52 = vmul.f32 %v3088_v46, %v2241_v11  ;;  %2388 = vst [vmem:[%s4668_s9 + $0x8] sm:$0xff] %v2354_v15  ;;  %v2349_v8 = vadd.f32 %v2432_v6, %v2348_v48 }
 0x8ae   :  { %v3004_v37 = vpop.f32.mrf.mxu1 }
 0x8af   :  { %v2243_v22 = vadd.f32 %v2242_v52, %v4761_v20  ;;  %2387 = vst [vmem:[%s4668_s9] sm:$0xff] %v2349_v8  ;;  %v2364_v29 = vadd.f32 %v3004_v37, %v2432_v6 }
 0x8b0   :  { %v2358_v31 = vpop.f32.mrf.mxu1 }
 0x8b1   :  { %3089 = vtanh.f32 %v2243_v22  ;;  %2390 = vst [vmem:[%s4668_s9 + $0x18] sm:$0xff] %v2364_v29  ;;  %v2359_v18 = vadd.f32 %v2432_v6, %v2358_v31 }
 0x8b2   :  { %v3007_v39 = vpop.f32.mrf.mxu1  ;;  %3091 = vrcp.f32 %v2238_v24 }
 0x8b3   :  { %2389 = vst [vmem:[%s4668_s9 + $0x10] sm:$0xff] %v2359_v18  ;;  %v2374_v41 = vadd.f32 %v3007_v39, %v2432_v6 }
 0x8b4   :  { %v2368_v43 = vpop.f32.mrf.mxu1 }
 0x8b5   :  { %2392 = vst [vmem:[%s4668_s9 + $0x28] sm:$0xff] %v2374_v41  ;;  %v2369_v45 = vadd.f32 %v2432_v6, %v2368_v43 }
 0x8b7   :  { %2391 = vst [vmem:[%s4668_s9 + $0x20] sm:$0xff] %v2369_v45 }
 0x8be   :  { %v3090_v47 = vpop.eup %3089 }
 0x8bf   :  { %v2245_v49 = vsub.f32 %v4571_v61, %v3090_v47  ;;  %v3092_v51 = vpop.eup %3091 }
 0x8c1   :  { %v2246_v16 = vmul.f32 %v3092_v51, %v2245_v49 }
 0x8c3   :  { %v2247_v33 = vadd.f32 %v3090_v47, %v2246_v16 }
 0x8c5   :  { %3009 = vmatmul.mubr.f32.gmra.mxu1 %v2247_v33 }
 0x985   :  { %v3010_v53 = vpop.f32.mrf.mxu1 }
 0x986   :  { %v2384_v5 = vadd.f32 %v3010_v53, %v2432_v6 }
 0x987   :  { %v2378_v59 = vpop.f32.mrf.mxu1 }
 0x988   :  { %2394 = vst [vmem:[%s4668_s9 + $0x38] sm:$0xff] %v2384_v5  ;;  %v2379_v12 = vadd.f32 %v2432_v6, %v2378_v59 }
 0x98a   :  { %2393 = vst [vmem:[%s4668_s9 + $0x30] sm:$0xff] %v2379_v12 }

</bundles_post_ra>
